<compile_context>
chip_gen: v7x
topology: tpu7x:2x2x1
jax: 0.10.0
libtpu: 0.0.40
codegen_flags: <defaults>
</compile_context>

<pallas_src>
import functools

import jax
import jax.numpy as jnp
from jax.experimental import pallas as pl
from jax.experimental.pallas import tpu as pltpu


def _rope_kernel(pos_ref, invf_ref, cos_ref, sin_ref, *, half,
                 attention_scaling):
    # pos_ref:  (R, TS)      int32 positions for R (section, batch) rows
    # invf_ref: (1, half)    float32 inverse frequencies (resident block)
    # cos_ref / sin_ref: (R, TS, head_dim) output tiles
    pos = pos_ref[...].astype(jnp.float32)           # (R, TS)
    invf = invf_ref[...]                             # (1, half)

    # freqs[r, s, d] = pos[r, s] * inv_freq[d]   -> (R, TS, half)
    freqs = pos[:, :, None] * invf[None, :, :]

    # Half-width transcendentals only; the full head_dim output is just the
    # same half duplicated (emb = cat((freqs, freqs), -1)).
    c = jnp.cos(freqs)
    s = jnp.sin(freqs)
    if attention_scaling != 1.0:
        c = c * attention_scaling
        s = s * attention_scaling
    c = c.astype(cos_ref.dtype)
    s = s.astype(sin_ref.dtype)

    cos_ref[:, :, :half] = c
    cos_ref[:, :, half:] = c
    sin_ref[:, :, :half] = s
    sin_ref[:, :, half:] = s


def _largest_divisor_leq(n, cap, multiple_of=1):
    cap = min(n, cap)
    d = (cap // multiple_of) * multiple_of
    while d >= multiple_of:
        if n % d == 0:
            return d
        d -= multiple_of
    return None


def _pick_s_tile(S, cap=2048):
    """Pick an S tile that divides S; prefer multiples of 128, then 8."""
    if S <= cap:
        return S
    for m in (128, 8, 1):
        d = _largest_divisor_leq(S, cap, m)
        if d is not None:
            return d
    return S


def _pick_row_block(N, bytes_per_row, target_bytes=512 * 1024):
    """Pick a row-block that divides N; target ~0.5 MiB output per step."""
    rows_target = max(1, target_bytes // max(1, bytes_per_row))
    if rows_target >= N:
        return N
    d = _largest_divisor_leq(N, rows_target, 8)   # prefer sublane-full rows
    if d is None:
        d = _largest_divisor_leq(N, rows_target, 1)
    return d if d is not None else N


def qwen25_vl_rotary_embedding(x, position_ids, inv_freq,
                               attention_scaling=1.0):
    """Pallas implementation of Qwen2_5_VLRotaryEmbedding.forward.

    Args:
      x:            (B, S, hidden) array; only its dtype is used.
      position_ids: (3, B, S) integer array.
      inv_freq:     (head_dim // 2,) float32 array.
      attention_scaling: python float.

    Returns:
      (cos, sin): each (3, B, S, head_dim), dtype = x.dtype.
    """
    three, B, S = position_ids.shape
    half = inv_freq.shape[0]
    head_dim = 2 * half
    out_dtype = x.dtype
    N = three * B

    # Glue: flatten the (3, B) leading axes; keep int32 (cast inside kernel).
    pos_flat = position_ids.reshape(N, S).astype(jnp.int32)
    invf_2d = inv_freq.reshape(1, half).astype(jnp.float32)

    TS = _pick_s_tile(S)
    out_bytes = jnp.dtype(out_dtype).itemsize
    R = _pick_row_block(N, TS * head_dim * out_bytes)

    kernel = functools.partial(_rope_kernel, half=half,
                               attention_scaling=float(attention_scaling))

    grid = (N // R, S // TS)

    out_shape = (
        jax.ShapeDtypeStruct((N, S, head_dim), out_dtype),
        jax.ShapeDtypeStruct((N, S, head_dim), out_dtype),
    )

    cos_flat, sin_flat = pl.pallas_call(
        kernel,
        out_shape=out_shape,
        grid_spec=pltpu.PrefetchScalarGridSpec(
            num_scalar_prefetch=0,
            grid=grid,
            in_specs=[
                pl.BlockSpec((R, TS), lambda i, j: (i, j)),
                pl.BlockSpec((1, half), lambda i, j: (0, 0)),
            ],
            out_specs=[
                pl.BlockSpec((R, TS, head_dim), lambda i, j: (i, j, 0)),
                pl.BlockSpec((R, TS, head_dim), lambda i, j: (i, j, 0)),
            ],
        ),
        compiler_params=pltpu.CompilerParams(
            dimension_semantics=("parallel", "parallel")),
    )(pos_flat, invf_2d)

    cos = cos_flat.reshape(three, B, S, head_dim)
    sin = sin_flat.reshape(three, B, S, head_dim)
    return cos, sin


def _reference(x, position_ids, inv_freq, attention_scaling=1.0):
    # Pure-JAX reference mirroring the PyTorch forward.
    pos = position_ids.astype(jnp.float32)                       # (3, B, S)
    freqs = pos[..., None] * inv_freq[None, None, None, :]       # (3, B, S, half)
    emb = jnp.concatenate([freqs, freqs], axis=-1)               # (3, B, S, D)
    cos = (jnp.cos(emb) * attention_scaling).astype(x.dtype)
    sin = (jnp.sin(emb) * attention_scaling).astype(x.dtype)
    return cos, sin


if __name__ == "__main__":
    # Deterministic "config": default rope -> attention_scaling = 1.0.
    # head_dim=128 matches real Qwen2.5-VL and makes output stores lane-dense.
    head_dim = 128
    rope_theta = 10000.0
    attention_scaling = 1.0

    inv_freq = 1.0 / (rope_theta ** (jnp.arange(0, head_dim, 2,
                                                dtype=jnp.float32) / head_dim))

    B, S, hidden = 2, 16, 32
    key = jax.random.PRNGKey(0)
    k_x, k_pos = jax.random.split(key)
    x = jax.random.normal(k_x, (B, S, hidden), dtype=jnp.float32)
    position_ids = jax.random.randint(k_pos, (3, B, S), minval=0, maxval=64,
                                      dtype=jnp.int32)

    cos, sin = qwen25_vl_rotary_embedding(x, position_ids, inv_freq,
                                          attention_scaling)
    cos, sin = jax.block_until_ready((cos, sin))

    cos_ref, sin_ref = _reference(x, position_ids, inv_freq, attention_scaling)
    assert cos.shape == (3, B, S, head_dim) and sin.shape == (3, B, S, head_dim)
    assert cos.dtype == x.dtype and sin.dtype == x.dtype
    assert jnp.allclose(cos, cos_ref, atol=1e-5, rtol=1e-5)
    assert jnp.allclose(sin, sin_ref, atol=1e-5, rtol=1e-5)

    print("KERNEL_OK")
</pallas_src>

<mosaic_0001>
module attributes {stable_mosaic.version = 11 : i64} {
  func.func @_rope_kernel(%arg0: i32, %arg1: i32, %arg2: memref<6x16xi32, #tpu.memory_space<vmem>>, %arg3: memref<1x64xf32, #tpu.memory_space<vmem>>, %arg4: memref<6x16x128xf32, #tpu.memory_space<vmem>>, %arg5: memref<6x16x128xf32, #tpu.memory_space<vmem>>) attributes {dimension_semantics = [#tpu.dimension_semantics<parallel>, #tpu.dimension_semantics<parallel>], iteration_bounds = array<i64: 1, 1>, scalar_prefetch = 0 : i64, scratch_operands = 0 : i64, tpu.core_type = #tpu.core_type<tc>, window_params = [{transform_indices = @transform_0, window_bounds = array<i64: 6, 16>}, {pipeline_mode = #tpu.pipeline_mode<synchronous>, transform_indices = @transform_1, window_bounds = array<i64: 1, 64>}, {transform_indices = @transform_2, window_bounds = array<i64: 6, 16, 128>}, {transform_indices = @transform_3, window_bounds = array<i64: 6, 16, 128>}]} {
    %c0 = arith.constant 0 : index
    %c0_0 = arith.constant 0 : index
    %0 = vector.load %arg2[%c0, %c0_0] : memref<6x16xi32, #tpu.memory_space<vmem>>, vector<6x16xi32>
    %1 = arith.sitofp %0 : vector<6x16xi32> to vector<6x16xf32>
    %c0_1 = arith.constant 0 : index
    %c0_2 = arith.constant 0 : index
    %2 = vector.load %arg3[%c0_1, %c0_2] : memref<1x64xf32, #tpu.memory_space<vmem>>, vector<1x64xf32>
    %3 = vector.shape_cast %1 : vector<6x16xf32> to vector<6x16x1xf32>
    %4 = vector.shape_cast %2 : vector<1x64xf32> to vector<1x1x64xf32>
    %5 = vector.broadcast %3 : vector<6x16x1xf32> to vector<6x16x64xf32>
    %6 = vector.broadcast %4 : vector<1x1x64xf32> to vector<6x16x64xf32>
    %7 = arith.mulf %5, %6 : vector<6x16x64xf32>
    %8 = math.cos %7 : vector<6x16x64xf32>
    %9 = math.sin %7 : vector<6x16x64xf32>
    %c0_3 = arith.constant 0 : index
    %c0_4 = arith.constant 0 : index
    %c0_5 = arith.constant 0 : index
    %10 = vector.load %arg4[%c0_3, %c0_4, %c0_5] : memref<6x16x128xf32, #tpu.memory_space<vmem>>, vector<6x16x64xf32>
    tpu.vector_store %arg4[%c0_3, %c0_4, %c0_5], %8 {strides = array<i32>} : memref<6x16x128xf32, #tpu.memory_space<vmem>>, vector<6x16x64xf32>,
    %c0_6 = arith.constant 0 : index
    %c0_7 = arith.constant 0 : index
    %c64 = arith.constant 64 : index
    %11 = vector.load %arg4[%c0_6, %c0_7, %c64] : memref<6x16x128xf32, #tpu.memory_space<vmem>>, vector<6x16x64xf32>
    tpu.vector_store %arg4[%c0_6, %c0_7, %c64], %8 {strides = array<i32>} : memref<6x16x128xf32, #tpu.memory_space<vmem>>, vector<6x16x64xf32>,
    %c0_8 = arith.constant 0 : index
    %c0_9 = arith.constant 0 : index
    %c0_10 = arith.constant 0 : index
    %12 = vector.load %arg5[%c0_8, %c0_9, %c0_10] : memref<6x16x128xf32, #tpu.memory_space<vmem>>, vector<6x16x64xf32>
    tpu.vector_store %arg5[%c0_8, %c0_9, %c0_10], %9 {strides = array<i32>} : memref<6x16x128xf32, #tpu.memory_space<vmem>>, vector<6x16x64xf32>,
    %c0_11 = arith.constant 0 : index
    %c0_12 = arith.constant 0 : index
    %c64_13 = arith.constant 64 : index
    %13 = vector.load %arg5[%c0_11, %c0_12, %c64_13] : memref<6x16x128xf32, #tpu.memory_space<vmem>>, vector<6x16x64xf32>
    tpu.vector_store %arg5[%c0_11, %c0_12, %c64_13], %9 {strides = array<i32>} : memref<6x16x128xf32, #tpu.memory_space<vmem>>, vector<6x16x64xf32>,
    return
  }
  func.func @transform_0(%arg0: i32, %arg1: i32) -> (i32, i32) {
    %c0_i32 = arith.constant 0 : i32
    return %arg0, %arg1 : i32, i32
  }
  func.func @transform_1(%arg0: i32, %arg1: i32) -> (i32, i32) {
    %c0_i32 = arith.constant 0 : i32
    %c0_i32_0 = arith.constant 0 : i32
    %c0_i32_1 = arith.constant 0 : i32
    return %c0_i32, %c0_i32_0 : i32, i32
  }
  func.func @transform_2(%arg0: i32, %arg1: i32) -> (i32, i32, i32) {
    %c0_i32 = arith.constant 0 : i32
    %c0_i32_0 = arith.constant 0 : i32
    return %arg0, %arg1, %c0_i32 : i32, i32, i32
  }
  func.func @transform_3(%arg0: i32, %arg1: i32) -> (i32, i32, i32) {
    %c0_i32 = arith.constant 0 : i32
    %c0_i32_0 = arith.constant 0 : i32
    return %arg0, %arg1, %c0_i32 : i32, i32, i32
  }
}

</mosaic_0001>

<bundles_post_ra>
// kernel: tpu_custom_call.1
= control target key start
LH: loop header
LB: loop body
LE: loop exit
PB: predicated region body
PF: predicated region fallthrough
CT: control target
= control target key end

     0   :  { %9 = vsyncpa [#allocation3], 0  ;;  %s4554_s0 = inlined_call_operand.hbm [shape: s32[6,16], index: 0, kind: input, shape index: {}]   ;;  %s4555_s1 = inlined_call_operand.vmem [shape: f32[1,64], index: 1, kind: input, shape index: {}]   ;;  %s4556_s2 = inlined_call_operand.hbm [shape: f32[6,16,128], index: 2, kind: output, shape index: {0}]   ;;  %s4557_s3 = inlined_call_operand.hbm [shape: f32[6,16,128], index: 3, kind: output, shape index: {1}]  }
   0x1   :  { %10 = vsyncpa [#allocation4], 0 }
   0x2   :  { %11 = vsyncpa [#allocation7], 0  ;;  %s3055_s12 = smov [#allocation2]   ;;  %s2983_s16 = scalar_lea.hbm %s4554_s0, 128 }
   0x3   :  { %s18_s13 = sshll.u32 %s3055_s12, 4  ;;  %p2984_p0 = scmp.ne.s32.totalorder %s4554_s0, %s2983_s16  ;;  %s19_s13 = int_to_ptr.vmem [resolvable:$true] %s18_s13 }
   0x4   :  { %p2987_p1 = scmp.lt.u32.totalorder %s2983_s16, %s4554_s0 }
   0x6   :  { %p2989_p2 = pnand %p2987_p1, %p2984_p0 }
   0x8   :  { %2992 = shalt.err (!%p2989_p2)
}
   0x9   :  { %s2993_s21 = scalar_lea.vmem %s19_s13, 128  ;;  %p2998_p4 = scmp.lt.s32.totalorder %s19_s13, %s19_s13 }
   0xa   :  { %p2994_p3 = scmp.ne.s32.totalorder %s19_s13, %s2993_s21  ;;  %p2999_p5 = scmp.lt.s32.totalorder %s2993_s21, %s2993_s21 }
   0xc   :  { %p3000_p6 = por %p2999_p5, %p2998_p4 }
   0xe   :  { %p3001_p7 = pnand %p3000_p6, %p2994_p3 }
  0x10   :  { %3004 = shalt.err (!%p3001_p7)
}
  0x11   :  { %21 = dma.hbm_to_vmem [thread:$0]  %s4554_s0, 128, %s19_s13, [#allocation3]  }
  0x12   :  { %3049 = dma.done.wait [#allocation3], 128  }
  0x13   :  { %3050 = vsyncadd [#allocation3], 4294967168  ;;  %v30_v0 = vlaneseq  ;;  %v27_v4 = vld [vmem:[#allocation2] sm:$0x3f]  ;;  %v4576_v55 = vmov 683565275  }
  0x14   :  { %v28_v5 = vcvt.s32.f32 %v27_v4  ;;  %v3102_v16 = vld [vmem:[%s4555_s1] ss:$0 sm:$0xff]  ;;  %v4571_v57 = vmov 2475754826   ;;  %v4569_v59 = vmov 2131351028  }
  0x15   :  { %v31_v1 = vshrl.u32 %v30_v0, 7  ;;  %v4567_v61 = vmov 2102212464   ;;  %v3060_v63 = vmov 920167782   ;;  %s3063_s27 = smov [#allocation5]  }
  0x16   :  { %s2749_s28 = sshll.u32 %s3063_s27, 4  ;;  %s2750_s28 = int_to_ptr.vmem [resolvable:$true] %s2749_s28 }
  0x17   :  { %v43_v2 = vsub.s32 1, %v31_v1  ;;  %v32_v3 = vsub.s32 0, %v31_v1  ;;  %v54_v8 = vsub.s32 2, %v31_v1  ;;  %v65_v10 = vsub.s32 3, %v31_v1  ;;  %s3005_s29 = scalar_lea.vmem %s2750_s28, 1536  ;;  %p3010_p9 = scmp.lt.s32.totalorder %s2750_s28, %s2750_s28 }
  0x18   :  { %v76_v12 = vsub.s32 4, %v31_v1  ;;  %v87_v14 = vsub.s32 5, %v31_v1  ;;  %p3006_p8 = scmp.ne.s32.totalorder %s2750_s28, %s3005_s29  ;;  %p3011_p10 = scmp.lt.s32.totalorder %s3005_s29, %s3005_s29 }
  0x19   :  { %v44_v6 = vrot.slane %v28_v5, %v43_v2  ;;  %v33_v7 = vrot.slane %v28_v5, %v32_v3  ;;  %v55_v9 = vrot.slane %v28_v5, %v54_v8  ;;  %v66_v11 = vrot.slane %v28_v5, %v65_v10 }
  0x1a   :  { %v77_v13 = vrot.slane %v28_v5, %v76_v12  ;;  %v88_v15 = vrot.slane %v28_v5, %v87_v14  ;;  %v4574_v8 = vmov 1326507024   ;;  %p3012_p11 = por %p3011_p10, %p3010_p9 }
  0x1b   :  { %46 = vbcast.lane.b32.xlu1 %v44_v6, 256  ;;  %35 = vbcast.lane.b32.xlu0 %v33_v7, 256 }
  0x1c   :  { %p3013_p12 = pnand %p3012_p11, %p3006_p8 }
  0x1f   :  { %50 = vbcast.lane.b32.xlu1 %v44_v6, 264  ;;  %39 = vbcast.lane.b32.xlu0 %v33_v7, 264 }
  0x23   :  { %61 = vbcast.lane.b32.xlu1 %v55_v9, 264  ;;  %57 = vbcast.lane.b32.xlu0 %v55_v9, 256 }
  0x27   :  { %72 = vbcast.lane.b32.xlu1 %v66_v11, 264  ;;  %68 = vbcast.lane.b32.xlu0 %v66_v11, 256 }
  0x2b   :  { %83 = vbcast.lane.b32.xlu1 %v77_v13, 264  ;;  %79 = vbcast.lane.b32.xlu0 %v77_v13, 256 }
  0x2f   :  { %94 = vbcast.lane.b32.xlu1 %v88_v15, 264  ;;  %90 = vbcast.lane.b32.xlu0 %v88_v15, 256 }
  0x8d   :  { %v47_v17 = vpop.permute.xlu1 %46  ;;  %v36_v18 = vpop.permute.xlu0 %35 }
  0x8e   :  { %v3105_v19 = vmul.f32 %v3102_v16, %v47_v17  ;;  %v3108_v20 = vmul.f32 %v3102_v16, %v36_v18 }
  0x90   :  { %v4564_v21 = vand.u32 2147483647, %v3105_v19  ;;  %v323_v22 = vand.u32 2139095040, %v3105_v19  ;;  %v4565_v23 = vand.u32 2147483647, %v3108_v20  ;;  %v117_v24 = vand.u32 2139095040, %v3108_v20 }
  0x91   :  { %v51_v25 = vpop.permute.xlu1 %50  ;;  %v40_v26 = vpop.permute.xlu0 %39 }
  0x92   :  { %v324_v27 = vshrl.u32 %v323_v22, 23  ;;  %v327_v28 = vand.u32 8388607, %v4564_v21  ;;  %v121_v29 = vand.u32 8388607, %v4565_v23  ;;  %v3119_v30 = vmul.f32 %v3102_v16, %v51_v25 }
  0x93   :  { %v118_v31 = vshrl.u32 %v117_v24, 23  ;;  %v3122_v32 = vmul.f32 %v3102_v16, %v40_v26 }
  0x94   :  { %v2786_v33 = vadd.s32 4294967169, %v324_v27  ;;  %v4562_v34 = vand.u32 2147483647, %v3119_v30  ;;  %v426_v36 = vand.u32 2139095040, %v3119_v30  ;;  %v328_v37 = vor.u32 8388608, %v327_v28 }
  0x95   :  { %v2778_v35 = vadd.s32 4294967169, %v118_v31  ;;  %v122_v39 = vor.u32 8388608, %v121_v29  ;;  %v220_v43 = vand.u32 2139095040, %v3122_v32 }
  0x96   :  { %v330_v38 = vadd.s32 1, %v2786_v33  ;;  %v427_v41 = vshrl.u32 %v426_v36, 23  ;;  %v3128_v42 = vand.u32 8388607, %v4562_v34  ;;  %v3131_v47 = vshll.u32 %v328_v37, 8 }
  0x97   :  { %v124_v40 = vadd.s32 1, %v2778_v35  ;;  %v3133_v49 = vshll.u32 %v122_v39, 8  ;;  %v3138_v53 = vshrl.u32 %v220_v43, 23 }
  0x98   :  { %vm331_vm0 = vcmp.gt.s32.totalorder %v330_v38, 0  ;;  %v2790_v45 = vadd.s32 4294967169, %v427_v41  ;;  %v431_v52 = vor.u32 8388608, %v3128_v42 }
  0x99   :  { %v332_v44 = vsel %vm331_vm0, %v330_v38, 0  ;;  %vm125_vm1 = vcmp.gt.s32.totalorder %v124_v40, 0 }
  0x9a   :  { %v334_v46 = vand.u32 31, %v332_v44  ;;  %v126_v48 = vsel %vm125_vm1, %v124_v40, 0  ;;  %v333_v50 = vshrl.u32 %v332_v44, 5  ;;  %v3147_v2 = vadd.s32 1, %v2790_v45 }
  0x9b   :  { %v3135_v51 = vand.u32 31, %v126_v48  ;;  %v3145_v1 = vshrl.u32 %v126_v48, 5 }
  0x9c   :  { %v335_v54 = vsub.s32 32, %v334_v46  ;;  %v337_v56 = vshll.u32 %v4576_v55, %v334_v46  ;;  %v340_v58 = vshll.u32 %v4571_v57, %v334_v46  ;;  %v343_v60 = vshll.u32 %v4569_v59, %v334_v46 }
  0x9d   :  { %v346_v62 = vshll.u32 %v4567_v61, %v334_v46  ;;  %v349_v0 = vshll.u32 %v3060_v63, %v334_v46  ;;  %vm352_vm2 = vcmp.lt.s32.totalorder %v333_v50, 1  ;;  %vm353_vm3 = vcmp.lt.s32.totalorder %v333_v50, 2 }
  0x9e   :  { %v336_v3 = vshrl.u32 %v4576_v55, %v335_v54  ;;  %v338_v4 = vshrl.u32 %v4571_v57, %v335_v54  ;;  %v341_v5 = vshrl.u32 %v4569_v59, %v335_v54  ;;  %v344_v6 = vshrl.u32 %v4567_v61, %v335_v54 }
  0x9f   :  { %v347_v7 = vshrl.u32 %v3060_v63, %v335_v54  ;;  %v350_v9 = vshrl.u32 %v4574_v8, %v335_v54  ;;  %v129_v13 = vsub.s32 32, %v3135_v51  ;;  %vm354_vm4 = vcmp.lt.s32.totalorder %v333_v50, 3 }
  0xa0   :  { %v339_v10 = vor.u32 %v338_v4, %v337_v56  ;;  %v342_v11 = vor.u32 %v341_v5, %v340_v58  ;;  %v345_v12 = vor.u32 %v344_v6, %v343_v60  ;;  %vm355_vm5 = vcmp.lt.s32.totalorder %v333_v50, 4 }
  0xa1   :  { %v348_v14 = vor.u32 %v347_v7, %v346_v62  ;;  %v351_v15 = vor.u32 %v350_v9, %v349_v0  ;;  %v131_v28 = vshll.u32 %v4576_v55, %v3135_v51  ;;  %v132_v33 = vshrl.u32 %v4571_v57, %v129_v13 }
  0xa2   :  { %v356_v17 = vsel %vm352_vm2, %v336_v3, %v339_v10  ;;  %v357_v18 = vsel %vm355_vm5, %v345_v12, 2102212464  ;;  %v360_v22 = vsel %vm352_vm2, %v339_v10, %v342_v11  ;;  %v364_v24 = vsel %vm352_vm2, %v342_v11, %v345_v12 }
  0xa3   :  { %v358_v25 = vsel %vm354_vm4, %v342_v11, %v357_v18  ;;  %v361_v26 = vsel %vm355_vm5, %v348_v14, 920167782  ;;  %v365_v27 = vsel %vm355_vm5, %v351_v15, 1326507024  ;;  %v134_v35 = vshll.u32 %v4571_v57, %v3135_v51 }
  0xa4   :  { %v362_v29 = vsel %vm354_vm4, %v345_v12, %v361_v26  ;;  %v366_v31 = vsel %vm354_vm4, %v348_v14, %v365_v27  ;;  %v359_v36 = vsel %vm353_vm3, %v356_v17, %v358_v25  ;;  %v135_v39 = vshrl.u32 %v4569_v59, %v129_v13 }
  0xa5   :  { %v363_v37 = vsel %vm353_vm3, %v360_v22, %v362_v29  ;;  %v367_v38 = vsel %vm353_vm3, %v364_v24, %v366_v31  ;;  %v133_v45 = vor.u32 %v132_v33, %v131_v28  ;;  %v137_v48 = vshll.u32 %v4569_v59, %v3135_v51 }
  0xa6   :  { %v3166_v40 = vmul.u32.u64.low %v3131_v47, %v367_v38  ;;  %v3167_v41 = vmul.u32.u64.high %v3131_v47, %v367_v38, %v3166_v40  ;;  %v3170_v43 = vmul.u32.u64.low %v3131_v47, %v363_v37  ;;  %v3171_v44 = vmul.u32.u64.high %v3131_v47, %v363_v37, %v3170_v43 }
  0xa7   :  { %v136_v46 = vor.u32 %v135_v39, %v134_v35  ;;  %v138_v54 = vshrl.u32 %v4567_v61, %v129_v13  ;;  %v130_v50 = vshrl.u32 %v4576_v55, %v129_v13  ;;  %v140_v56 = vshll.u32 %v4567_v61, %v3135_v51 }
  0xa8   :  { %v141_v58 = vshrl.u32 %v3060_v63, %v129_v13  ;;  %v144_v60 = vshrl.u32 %v4574_v8, %v129_v13  ;;  %v375_v62 = vmul.u32 %v3131_v47, %v359_v36  ;;  %v143_v3 = vshll.u32 %v3060_v63, %v3135_v51 }
  0xa9   :  { %v139_v0 = vor.u32 %v138_v54, %v137_v48  ;;  %vm146_vm6 = vcmp.lt.s32.totalorder %v3145_v1, 1  ;;  %vm377_vm7 = vc.u32 %v3167_v41, %v3170_v43  ;;  %v378_v4 = vadd.s32 1, %v3171_v44 }
  0xaa   :  { %v142_v5 = vor.u32 %v141_v58, %v140_v56  ;;  %vm147_vm8 = vcmp.lt.s32.totalorder %v3145_v1, 2  ;;  %v145_v6 = vor.u32 %v144_v60, %v143_v3  ;;  %vm148_vm9 = vcmp.lt.s32.totalorder %v3145_v1, 3 }
  0xab   :  { %vm149_vm10 = vcmp.lt.s32.totalorder %v3145_v1, 4  ;;  %v154_v47 = vsel %vm146_vm6, %v133_v45, %v136_v46  ;;  %v379_v7 = vsel %vm377_vm7, %v378_v4, %v3171_v44  ;;  %v158_v10 = vsel %vm146_vm6, %v136_v46, %v139_v0 }
  0xac   :  { %v151_v9 = vsel %vm149_vm10, %v139_v0, 2102212464  ;;  %v155_v51 = vsel %vm149_vm10, %v142_v5, 920167782  ;;  %v380_v11 = vadd.s32 %v379_v7, %v375_v62  ;;  %v150_v12 = vsel %vm146_vm6, %v130_v50, %v133_v45 }
  0xad   :  { %v156_v13 = vsel %vm148_vm9, %v139_v0, %v155_v51  ;;  %v159_v14 = vsel %vm149_vm10, %v145_v6, 1326507024  ;;  %v152_v15 = vsel %vm148_vm9, %v136_v46, %v151_v9  ;;  %vm434_vm11 = vcmp.gt.s32.totalorder %v3147_v2, 0 }
  0xae   :  { %v157_v17 = vsel %vm147_vm8, %v154_v47, %v156_v13  ;;  %v160_v18 = vsel %vm148_vm9, %v142_v5, %v159_v14  ;;  %v381_v22 = vadd.s32 536870912, %v380_v11  ;;  %v435_v29 = vsel %vm434_vm11, %v3147_v2, 0 }
  0xaf   :  { %v161_v24 = vsel %vm147_vm8, %v158_v10, %v160_v18  ;;  %v3199_v25 = vmul.u32.u64.low %v3133_v49, %v157_v17  ;;  %v3200_v26 = vmul.u32.u64.high %v3133_v49, %v157_v17, %v3199_v25  ;;  %v153_v33 = vsel %vm147_vm8, %v150_v12, %v152_v15 }
  0xb0   :  { %v3204_v27 = vmul.u32.u64.low %v3133_v49, %v161_v24  ;;  %v3205_v28 = vmul.u32.u64.high %v3133_v49, %v161_v24, %v3204_v27  ;;  %v3208_v31 = vshrl.u32 %v381_v22, 30  ;;  %v437_v35 = vand.u32 31, %v435_v29 }
  0xb1   :  { %v3214_v36 = vshll.u32 %v431_v52, 8  ;;  %v4563_v37 = vand.u32 2147483647, %v3122_v32  ;;  %v2782_v38 = vadd.s32 4294967169, %v3138_v53  ;;  %v172_v40 = vadd.s32 1, %v3200_v26 }
  0xb2   :  { %v383_v39 = vshll.u32 %v3208_v31, 30  ;;  %v438_v44 = vsub.s32 32, %v437_v35  ;;  %v440_v2 = vshll.u32 %v4576_v55, %v437_v35  ;;  %v169_v45 = vmul.u32 %v3133_v49, %v153_v33 }
  0xb3   :  { %vm171_vm12 = vc.u32 %v3205_v28, %v3199_v25  ;;  %v443_v42 = vshll.u32 %v4571_v57, %v437_v35  ;;  %v446_v52 = vshll.u32 %v4569_v59, %v437_v35  ;;  %v436_v46 = vshrl.u32 %v435_v29, 5 }
  0xb4   :  { %v3226_v1 = vsub.s32 %v380_v11, %v383_v39  ;;  %v173_v53 = vsel %vm171_vm12, %v172_v40, %v3200_v26  ;;  %v441_v48 = vshrl.u32 %v4571_v57, %v438_v44  ;;  %v444_v50 = vshrl.u32 %v4569_v59, %v438_v44 }
  0xb5   :  { %v174_v54 = vadd.s32 %v173_v53, %v169_v45  ;;  %v447_v56 = vshrl.u32 %v4567_v61, %v438_v44  ;;  %v449_v49 = vshll.u32 %v4567_v61, %v437_v35  ;;  %v450_v62 = vshrl.u32 %v3060_v63, %v438_v44 }
  0xb6   :  { %v386_v58 = vsub.s32 0, %v3226_v1  ;;  %v442_v60 = vor.u32 %v441_v48, %v440_v2  ;;  %v452_v0 = vshll.u32 %v3060_v63, %v437_v35  ;;  %v445_v4 = vor.u32 %v444_v50, %v443_v42  ;;  %v62_v2 = vpop.permute.xlu1 %61 }
  0xb7   :  { %v175_v3 = vadd.s32 536870912, %v174_v54  ;;  %v448_v5 = vor.u32 %v447_v56, %v446_v52  ;;  %v453_v6 = vshrl.u32 %v4574_v8, %v438_v44  ;;  %v439_v7 = vshrl.u32 %v4576_v55, %v438_v44 }
  0xb8   :  { %v2787_v47 = vmin.u32 %v386_v58, %v3226_v1  ;;  %v451_v9 = vor.u32 %v450_v62, %v449_v49  ;;  %v227_v51 = vadd.s32 1, %v2782_v38  ;;  %vm455_vm13 = vcmp.lt.s32.totalorder %v436_v46, 1 }
  0xb9   :  { %v3239_v10 = vshrl.u32 %v175_v3, 30  ;;  %v454_v11 = vor.u32 %v453_v6, %v452_v0  ;;  %vm458_vm14 = vcmp.lt.s32.totalorder %v436_v46, 4  ;;  %vm456_vm15 = vcmp.lt.s32.totalorder %v436_v46, 2 }
  0xba   :  { %v388_v12 = vclz %v2787_v47  ;;  %v460_v13 = vsel %vm458_vm14, %v448_v5, 2102212464  ;;  %v463_v14 = vsel %vm455_vm13, %v442_v60, %v445_v4  ;;  %vm457_vm0 = vcmp.lt.s32.totalorder %v436_v46, 3 }
  0xbb   :  { %v177_v15 = vshll.u32 %v3239_v10, 30  ;;  %v464_v17 = vsel %vm458_vm14, %v451_v9, 920167782  ;;  %v467_v18 = vsel %vm455_vm13, %v445_v4, %v448_v5  ;;  %v459_v24 = vsel %vm455_vm13, %v439_v7, %v442_v60 }
  0xbc   :  { %v2788_v22 = vadd.s32 4294967294, %v388_v12  ;;  %v465_v26 = vsel %vm457_vm0, %v448_v5, %v464_v17  ;;  %v468_v27 = vsel %vm458_vm14, %v454_v11, 1326507024  ;;  %v461_v33 = vsel %vm457_vm0, %v445_v4, %v460_v13 }
  0xbd   :  { %v3242_v29 = vsub.s32 %v174_v54, %v177_v15  ;;  %v466_v35 = vsel %vm456_vm15, %v463_v14, %v465_v26  ;;  %v469_v38 = vsel %vm457_vm0, %v451_v9, %v468_v27  ;;  %v462_v48 = vsel %vm456_vm15, %v459_v24, %v461_v33 }
  0xbe   :  { %vm2789_vm1 = vcmp.lt.s32.totalorder %v2788_v22, 0  ;;  %v470_v39 = vsel %vm456_vm15, %v467_v18, %v469_v38  ;;  %v3247_v40 = vmul.u32.u64.low %v3214_v36, %v466_v35  ;;  %v3248_v44 = vmul.u32.u64.high %v3214_v36, %v466_v35, %v3247_v40 }
  0xbf   :  { %v3251_v45 = vsel %vm2789_vm1, 0, %v2788_v22  ;;  %v180_v42 = vsub.s32 0, %v3242_v29  ;;  %v3255_v52 = vmul.u32.u64.low %v3214_v36, %v470_v39  ;;  %v3256_v53 = vmul.u32.u64.high %v3214_v36, %v470_v39, %v3255_v52 }
  0xc0   :  { %v224_v54 = vand.u32 8388607, %v4563_v37  ;;  %vm228_vm2 = vcmp.gt.s32.totalorder %v227_v51, 0  ;;  %v3263_v49 = vmul.f32 %v3102_v16, %v62_v2  ;;  %v396_v58 = vsub.s32 4294967266, %v3251_v45 }
  0xc1   :  { %v2779_v50 = vmin.u32 %v180_v42, %v3242_v29  ;;  %v229_v56 = vsel %vm228_vm2, %v227_v51, 0  ;;  %v481_v60 = vadd.s32 1, %v3248_v44  ;;  %v478_v0 = vmul.u32 %v3214_v36, %v462_v48 }
  0xc2   :  { %4611 = vst [vmem:[#allocation11_spill] sm:$0xff] %v3263_v49  ;;  %vm480_vm3 = vc.u32 %v3256_v53, %v3247_v40  ;;  %v231_v46 = vand.u32 31, %v229_v56  ;;  %v376_v3 = vadd.s32 %v3170_v43, %v3167_v41  ;;  %v225_v5 = vor.u32 8388608, %v224_v54 }
  0xc3   :  { %v182_v62 = vclz %v2779_v50  ;;  %v482_v4 = vsel %vm480_vm3, %v481_v60, %v3248_v44  ;;  %v4560_v6 = vand.u32 2147483647, %v3263_v49  ;;  %v632_v51 = vand.u32 2139095040, %v3263_v49 }
  0xc4   :  { %v483_v7 = vadd.s32 %v482_v4, %v478_v0  ;;  %v232_v9 = vsub.s32 32, %v231_v46  ;;  %v392_v11 = vsub.s32 32, %v3251_v45  ;;  %v393_v36 = vshll.u32 %v3226_v1, %v3251_v45 }
  0xc5   :  { %v2780_v47 = vadd.s32 4294967294, %v182_v62  ;;  %v397_v12 = vadd.s32 127, %v396_v58  ;;  %v170_v13 = vadd.s32 %v3199_v25, %v3205_v28  ;;  %v3280_v43 = vshrl.u32 %v229_v56, 5 }
  0xc6   :  { %v484_v41 = vadd.s32 536870912, %v483_v7  ;;  %v235_v14 = vshrl.u32 %v4571_v57, %v232_v9  ;;  %v234_v17 = vshll.u32 %v4576_v55, %v231_v46  ;;  %v238_v18 = vshrl.u32 %v4569_v59, %v232_v9 }
  0xc7   :  { %vm2781_vm4 = vcmp.lt.s32.totalorder %v2780_v47, 0  ;;  %v241_v22 = vshrl.u32 %v4567_v61, %v232_v9  ;;  %v237_v1 = vshll.u32 %v4571_v57, %v231_v46  ;;  %v240_v25 = vshll.u32 %v4569_v59, %v231_v46 }
  0xc8   :  { %v185_v15 = vsel %vm2781_vm4, 0, %v2780_v47  ;;  %v3286_v26 = vshrl.u32 %v484_v41, 30  ;;  %v398_v28 = vshll.u32 %v397_v12, 23  ;;  %v236_v27 = vor.u32 %v235_v14, %v234_v17 }
  0xc9   :  { %v190_v24 = vsub.s32 4294967266, %v185_v15  ;;  %v3290_v33 = vshll.u32 %v225_v5, 8  ;;  %v633_v35 = vshrl.u32 %v632_v51, 23  ;;  %v239_v44 = vor.u32 %v238_v18, %v237_v1 }
  0xca   :  { %v486_v39 = vshll.u32 %v3286_v26, 30  ;;  %v242_v2 = vor.u32 %v241_v22, %v240_v25  ;;  %v243_v45 = vshll.u32 %v4567_v61, %v231_v46  ;;  %v244_v42 = vshrl.u32 %v3060_v63, %v232_v9 }
  0xcb   :  { %v191_v38 = vadd.s32 127, %v190_v24  ;;  %v246_v52 = vshll.u32 %v3060_v63, %v231_v46  ;;  %v247_v48 = vshrl.u32 %v4574_v8, %v232_v9  ;;  %v394_v54 = vshrl.u32 %v376_v3, %v392_v11 }
  0xcc   :  { %v186_v50 = vsub.s32 32, %v185_v15  ;;  %v3297_v56 = vsub.s32 %v483_v7, %v486_v39  ;;  %vm249_vm5 = vcmp.lt.s32.totalorder %v3280_v43, 1  ;;  %v399_v58 = vor.u32 4788187, %v398_v28 }
  0xcd   :  { %v192_v60 = vshll.u32 %v191_v38, 23  ;;  %v245_v62 = vor.u32 %v244_v42, %v243_v45  ;;  %v248_v0 = vor.u32 %v247_v48, %v246_v52  ;;  %v187_v4 = vshll.u32 %v3242_v29, %v185_v15 }
  0xce   :  { %v489_v5 = vsub.s32 0, %v3297_v56  ;;  %v233_v47 = vshrl.u32 %v4576_v55, %v232_v9  ;;  %vm252_vm6 = vcmp.lt.s32.totalorder %v3280_v43, 4  ;;  %vm251_vm7 = vcmp.lt.s32.totalorder %v3280_v43, 3 }
  0xcf   :  { %v254_v46 = vsel %vm252_vm6, %v242_v2, 2102212464  ;;  %v257_v3 = vsel %vm249_vm5, %v236_v27, %v239_v44  ;;  %v258_v7 = vsel %vm252_vm6, %v245_v62, 920167782  ;;  %v188_v51 = vshrl.u32 %v170_v13, %v186_v50 }
  0xd0   :  { %v2791_v11 = vmin.u32 %v489_v5, %v3297_v56  ;;  %vm250_vm8 = vcmp.lt.s32.totalorder %v3280_v43, 2  ;;  %v259_v12 = vsel %vm251_vm7, %v242_v2, %v258_v7  ;;  %v193_v29 = vor.u32 4788187, %v192_v60  ;;  %v58_v60 = vpop.permute.xlu0 %57 }
  0xd1   :  { %v260_v41 = vsel %vm250_vm8, %v257_v3, %v259_v12  ;;  %v261_v9 = vsel %vm249_vm5, %v239_v44, %v242_v2  ;;  %v262_v14 = vsel %vm252_vm6, %v248_v0, 1326507024  ;;  %v253_v17 = vsel %vm249_vm5, %v233_v47, %v236_v27 }
  0xd2   :  { %v491_v15 = vclz %v2791_v11  ;;  %v255_v18 = vsel %vm251_vm7, %v239_v44, %v254_v46  ;;  %v263_v22 = vsel %vm251_vm7, %v245_v62, %v262_v14  ;;  %v2798_v25 = vadd.s32 4294967169, %v633_v35 }
  0xd3   :  { %v264_v13 = vsel %vm250_vm8, %v261_v9, %v263_v22  ;;  %v3318_v24 = vmul.u32.u64.low %v3290_v33, %v260_v41  ;;  %v3319_v1 = vmul.u32.u64.high %v3290_v33, %v260_v41, %v3318_v24  ;;  %v395_v28 = vor.u32 %v394_v54, %v393_v36 }
  0xd4   :  { %v2792_v38 = vadd.s32 4294967294, %v491_v15  ;;  %v3323_v39 = vmul.u32.u64.low %v3290_v33, %v264_v13  ;;  %v3324_v2 = vmul.u32.u64.high %v3290_v33, %v264_v13, %v3323_v39  ;;  %v189_v45 = vor.u32 %v188_v51, %v187_v4  ;;  %v73_v4 = vpop.permute.xlu1 %72 }
  0xd5   :  { %v636_v27 = vand.u32 8388607, %v4560_v6  ;;  %v639_v44 = vadd.s32 1, %v2798_v25  ;;  %v400_v42 = vand.u32 2147483647, %v399_v58  ;;  %v256_v52 = vsel %vm250_vm8, %v253_v17, %v255_v18 }
  0xd6   :  { %vm2793_vm9 = vcmp.lt.s32.totalorder %v2792_v38, 0  ;;  %v194_v48 = vand.u32 2147483647, %v193_v29  ;;  %v275_v36 = vadd.s32 1, %v3319_v1  ;;  %v402_v35 = vcvt.s32.f32 %v395_v28 }
  0xd7   :  { %v3330_v50 = vsel %vm2793_vm9, 0, %v2792_v38  ;;  %vm640_vm10 = vcmp.gt.s32.totalorder %v639_v44, 0  ;;  %v637_v54 = vor.u32 8388608, %v636_v27  ;;  %v196_v62 = vcvt.s32.f32 %v189_v45 }
  0xd8   :  { %v272_v0 = vmul.u32 %v3290_v33, %v256_v52  ;;  %vm274_vm11 = vc.u32 %v3324_v2, %v3318_v24  ;;  %v641_v58 = vsel %vm640_vm10, %v639_v44, 0  ;;  %v3336_v5 = vmul.f32 %v402_v35, %v400_v42 }
  0xd9   :  { %v479_v43 = vadd.s32 %v3247_v40, %v3256_v53  ;;  %v499_v47 = vsub.s32 4294967266, %v3330_v50  ;;  %v276_v46 = vsel %vm274_vm11, %v275_v36, %v3319_v1  ;;  %v3342_v3 = vmul.f32 %v196_v62, %v194_v48 }
  0xda   :  { %v277_v7 = vadd.s32 %v276_v46, %v272_v0  ;;  %v643_v51 = vand.u32 31, %v641_v58  ;;  %v3345_v33 = vmul.f32 %v3102_v16, %v58_v60  ;;  %v495_v11 = vsub.s32 32, %v3330_v50 }
  0xdb   :  { %v496_v12 = vshll.u32 %v3297_v56, %v3330_v50  ;;  %v3350_v29 = vshll.u32 %v637_v54, 8  ;;  %v3353_v40 = vmul.f32 %v3102_v16, %v73_v4  ;;  %v500_v15 = vadd.s32 127, %v499_v47 }
  0xdc   :  { %v278_v53 = vadd.s32 536870912, %v277_v7  ;;  %v644_v41 = vsub.s32 32, %v643_v51  ;;  %v646_v9 = vshll.u32 %v4576_v55, %v643_v51  ;;  %v649_v14 = vshll.u32 %v4571_v57, %v643_v51 }
  0xdd   :  { %v652_v17 = vshll.u32 %v4569_v59, %v643_v51  ;;  %v655_v18 = vshll.u32 %v4567_v61, %v643_v51  ;;  %v4561_v22 = vand.u32 2147483647, %v3345_v33  ;;  %v642_v1 = vshrl.u32 %v641_v58, 5 }
  0xde   :  { %v3360_v13 = vshrl.u32 %v278_v53, 30  ;;  %v647_v25 = vshrl.u32 %v4571_v57, %v644_v41  ;;  %v650_v28 = vshrl.u32 %v4569_v59, %v644_v41  ;;  %v653_v38 = vshrl.u32 %v4567_v61, %v644_v41 }
  0xdf   :  { %v656_v39 = vshrl.u32 %v3060_v63, %v644_v41  ;;  %v658_v45 = vshll.u32 %v3060_v63, %v643_v51  ;;  %v529_v27 = vand.u32 2139095040, %v3345_v33  ;;  %v659_v48 = vshrl.u32 %v4574_v8, %v644_v41 }
  0xe0   :  { %v280_v44 = vshll.u32 %v3360_v13, 30  ;;  %v648_v42 = vor.u32 %v647_v25, %v646_v9  ;;  %v651_v52 = vor.u32 %v650_v28, %v649_v14  ;;  %v501_v36 = vshll.u32 %v500_v15, 23 }
  0xe1   :  { %v645_v35 = vshrl.u32 %v4576_v55, %v644_v41  ;;  %v654_v54 = vor.u32 %v653_v38, %v652_v17  ;;  %v657_v60 = vor.u32 %v656_v39, %v655_v18  ;;  %v660_v0 = vor.u32 %v659_v48, %v658_v45 }
  0xe2   :  { %v3371_v62 = vsub.s32 %v277_v7, %v280_v44  ;;  %vm661_vm12 = vcmp.lt.s32.totalorder %v642_v1, 1  ;;  %vm664_vm13 = vcmp.lt.s32.totalorder %v642_v1, 4  ;;  %vm663_vm14 = vcmp.lt.s32.totalorder %v642_v1, 3 }
  0xe3   :  { %v666_v58 = vsel %vm664_vm13, %v654_v54, 2102212464  ;;  %v669_v4 = vsel %vm661_vm12, %v648_v42, %v651_v52  ;;  %v670_v47 = vsel %vm664_vm13, %v657_v60, 920167782  ;;  %vm662_vm15 = vcmp.lt.s32.totalorder %v642_v1, 2 }
  0xe4   :  { %v283_v46 = vsub.s32 0, %v3371_v62  ;;  %v671_v51 = vsel %vm663_vm14, %v654_v54, %v670_v47  ;;  %v673_v53 = vsel %vm661_vm12, %v651_v52, %v654_v54  ;;  %v665_v9 = vsel %vm661_vm12, %v645_v35, %v648_v42 }
  0xe5   :  { %v667_v14 = vsel %vm663_vm14, %v651_v52, %v666_v58  ;;  %v672_v15 = vsel %vm662_vm15, %v669_v4, %v671_v51  ;;  %v674_v41 = vsel %vm664_vm13, %v660_v0, 1326507024  ;;  %v497_v28 = vshrl.u32 %v479_v43, %v495_v11 }
  0xe6   :  { %v2783_v17 = vmin.u32 %v283_v46, %v3371_v62  ;;  %v675_v7 = vsel %vm663_vm14, %v657_v60, %v674_v41  ;;  %v3376_v18 = vmul.u32.u64.low %v3350_v29, %v672_v15  ;;  %v3377_v25 = vmul.u32.u64.high %v3350_v29, %v672_v15, %v3376_v18 }
  0xe7   :  { %v502_v38 = vor.u32 4788187, %v501_v36  ;;  %v676_v39 = vsel %vm662_vm15, %v673_v53, %v675_v7  ;;  %v530_v45 = vshrl.u32 %v529_v27, 23  ;;  %v668_v1 = vsel %vm662_vm15, %v665_v9, %v667_v14  ;;  %v69_v14 = vpop.permute.xlu0 %68 }
  0xe8   :  { %v285_v44 = vclz %v2783_v17  ;;  %v3381_v48 = vmul.u32.u64.low %v3350_v29, %v676_v39  ;;  %v3382_v42 = vmul.u32.u64.high %v3350_v29, %v676_v39, %v3381_v48  ;;  %v533_v35 = vand.u32 8388607, %v4561_v22 }
  0xe9   :  { %v2794_v52 = vadd.s32 4294967169, %v530_v45  ;;  %v4558_v54 = vand.u32 2147483647, %v3353_v40  ;;  %v838_v60 = vand.u32 2139095040, %v3353_v40  ;;  %vm322_vm0 = vcmp.lt.s32.totalorder %v3105_v19, 0 }
  0xea   :  { %v404_v43 = vxor.u32 2147483648, %v3336_v5  ;;  %v2784_v11 = vadd.s32 4294967294, %v285_v44  ;;  %v687_v27 = vadd.s32 1, %v3377_v25  ;;  %v198_v36 = vxor.u32 2147483648, %v3342_v3 }
  0xeb   :  { %v498_v0 = vor.u32 %v497_v28, %v496_v12  ;;  %v503_v58 = vand.u32 2147483647, %v502_v38  ;;  %v536_v4 = vadd.s32 1, %v2794_v52  ;;  %v684_v47 = vmul.u32 %v3350_v29, %v668_v1 }
  0xec   :  { %vm2785_vm1 = vcmp.lt.s32.totalorder %v2784_v11, 0  ;;  %vm686_vm2 = vc.u32 %v3382_v42, %v3376_v18  ;;  %v839_v46 = vshrl.u32 %v838_v60, 23  ;;  %v534_v53 = vor.u32 8388608, %v533_v35 }
  0xed   :  { %v688_v51 = vsel %vm686_vm2, %v687_v27, %v3377_v25  ;;  %vm537_vm3 = vcmp.gt.s32.totalorder %v536_v4, 0  ;;  %v3401_v9 = vand.u32 8388607, %v4558_v54  ;;  %v3406_v56 = vsel %vm322_vm0, %v404_v43, %v3336_v5 }
  0xee   :  { %vm116_vm4 = vcmp.lt.s32.totalorder %v3108_v20, 0  ;;  %v689_v50 = vadd.s32 %v688_v51, %v684_v47  ;;  %v505_v29 = vcvt.s32.f32 %v498_v0  ;;  %v3414_v15 = vsel %vm2785_vm1, 0, %v2784_v11 }
  0xef   :  { %v3412_v12 = vsel %vm116_vm4, %v198_v36, %v3342_v3  ;;  %v538_v41 = vsel %vm537_vm3, %v536_v4, 0  ;;  %v273_v17 = vadd.s32 %v3318_v24, %v3324_v2  ;;  %v2806_v25 = vadd.s32 4294967169, %v839_v46 }
  0xf0   :  { %v690_v7 = vadd.s32 536870912, %v689_v50  ;;  %v3419_v5 = vmul.f32 %v3102_v16, %v69_v14  ;;  %v3421_v28 = vmul.f32 %v505_v29, %v503_v58  ;;  %v540_v38 = vand.u32 31, %v538_v41 }
  0xf1   :  { %v3423_v39 = vshll.u32 %v534_v53, 8  ;;  %v843_v3 = vor.u32 8388608, %v3401_v9  ;;  %v289_v45 = vsub.s32 32, %v3414_v15  ;;  %v290_v44 = vshll.u32 %v3371_v62, %v3414_v15 }
  0xf2   :  { %v293_v1 = vsub.s32 4294967266, %v3414_v15  ;;  %v3430_v24 = vshrl.u32 %v690_v7, 30  ;;  %v541_v2 = vsub.s32 32, %v540_v38  ;;  %v543_v16 = vshll.u32 %v4576_v55, %v540_v38 }
  0xf3   :  { %v546_v48 = vshll.u32 %v4571_v57, %v540_v38  ;;  %v549_v52 = vshll.u32 %v4569_v59, %v540_v38  ;;  %v552_v60 = vshll.u32 %v4567_v61, %v540_v38  ;;  %v845_v43 = vadd.s32 1, %v2806_v25 }
  0xf4   :  { %4612 = vst [vmem:[#allocation12_spill] sm:$0xff] %v3430_v24  ;;  %v692_v35 = vshll.u32 %v3430_v24, 30  ;;  %v735_v11 = vand.u32 2139095040, %v3419_v5  ;;  %v539_v27 = vshrl.u32 %v538_v41, 5  ;;  %v544_v62 = vshrl.u32 %v4571_v57, %v541_v2 }
  0xf5   :  { %v547_v36 = vshrl.u32 %v4569_v59, %v541_v2  ;;  %v550_v0 = vshrl.u32 %v4567_v61, %v541_v2  ;;  %v294_v58 = vadd.s32 127, %v293_v1  ;;  %v553_v47 = vshrl.u32 %v3060_v63, %v541_v2 }
  0xf6   :  { %v3441_v4 = vsub.s32 %v689_v50, %v692_v35  ;;  %v555_v46 = vshll.u32 %v3060_v63, %v540_v38  ;;  %v545_v51 = vor.u32 %v544_v62, %v543_v16  ;;  %v556_v29 = vshrl.u32 %v4574_v8, %v541_v2 }
  0xf7   :  { %v548_v53 = vor.u32 %v547_v36, %v546_v48  ;;  %v551_v14 = vor.u32 %v550_v0, %v549_v52  ;;  %v291_v15 = vshrl.u32 %v273_v17, %v289_v45  ;;  %v542_v7 = vshrl.u32 %v4576_v55, %v541_v2 }
  0xf8   :  { %v695_v41 = vsub.s32 0, %v3441_v4  ;;  %v554_v25 = vor.u32 %v553_v47, %v552_v60  ;;  %v557_v54 = vor.u32 %v556_v29, %v555_v46  ;;  %vm558_vm5 = vcmp.lt.s32.totalorder %v539_v27, 1 }
  0xf9   :  { %vm561_vm6 = vcmp.lt.s32.totalorder %v539_v27, 4  ;;  %vm846_vm7 = vcmp.gt.s32.totalorder %v845_v43, 0  ;;  %v295_v50 = vshll.u32 %v294_v58, 23  ;;  %v566_v38 = vsel %vm558_vm5, %v545_v51, %v548_v53 }
  0xfa   :  { %v2799_v1 = vmin.u32 %v695_v41, %v3441_v4  ;;  %v563_v35 = vsel %vm561_vm6, %v551_v14, 2102212464  ;;  %vm560_vm8 = vcmp.lt.s32.totalorder %v539_v27, 3  ;;  %v567_v16 = vsel %vm561_vm6, %v554_v25, 920167782 }
  0xfb   :  { %v570_v48 = vsel %vm558_vm5, %v548_v53, %v551_v14  ;;  %v571_v52 = vsel %vm561_vm6, %v557_v54, 1326507024  ;;  %vm559_vm9 = vcmp.lt.s32.totalorder %v539_v27, 2  ;;  %v562_v17 = vsel %vm558_vm5, %v542_v7, %v545_v51 }
  0xfc   :  { %v697_v62 = vclz %v2799_v1  ;;  %v568_v45 = vsel %vm560_vm8, %v551_v14, %v567_v16  ;;  %v564_v36 = vsel %vm560_vm8, %v548_v53, %v563_v35  ;;  %v572_v60 = vsel %vm560_vm8, %v554_v25, %v571_v52 }
  0xfd   :  { %v569_v2 = vsel %vm559_vm9, %v566_v38, %v568_v45  ;;  %v847_v0 = vsel %vm846_vm7, %v845_v43, 0  ;;  %v573_v58 = vsel %vm559_vm9, %v570_v48, %v572_v60  ;;  %v4559_v53 = vand.u32 2147483647, %v3419_v5 }
  0xfe   :  { %v2800_v47 = vadd.s32 4294967294, %v697_v62  ;;  %v3453_v46 = vmul.u32.u64.low %v3423_v39, %v569_v2  ;;  %v3454_v29 = vmul.u32.u64.high %v3423_v39, %v569_v2, %v3453_v46  ;;  %v849_v51 = vand.u32 31, %v847_v0 }
  0xff   :  { %v3458_v54 = vmul.u32.u64.low %v3423_v39, %v573_v58  ;;  %v3459_v41 = vmul.u32.u64.high %v3423_v39, %v573_v58, %v3458_v54  ;;  %v292_v14 = vor.u32 %v291_v15, %v290_v44  ;;  %v296_v7 = vor.u32 4788187, %v295_v50 }
 0x100   :  { %vm2801_vm10 = vcmp.lt.s32.totalorder %v2800_v47, 0  ;;  %v565_v43 = vsel %vm559_vm9, %v562_v17, %v564_v36  ;;  %v685_v25 = vadd.s32 %v3376_v18, %v3382_v42  ;;  %v850_v1 = vsub.s32 32, %v849_v51 }
 0x101   :  { %v3467_v35 = vshll.u32 %v843_v3, 8  ;;  %v736_v38 = vshrl.u32 %v735_v11, 23  ;;  %v700_v16 = vsel %vm2801_vm10, 0, %v2800_v47  ;;  %v584_v48 = vadd.s32 1, %v3454_v29 }
 0x102   :  { %v852_v52 = vshll.u32 %v4576_v55, %v849_v51  ;;  %v855_v44 = vshll.u32 %v4571_v57, %v849_v51  ;;  %v581_v15 = vmul.u32 %v3423_v39, %v565_v43  ;;  %vm583_vm11 = vc.u32 %v3459_v41, %v3453_v46 }
 0x103   :  { %v853_v18 = vshrl.u32 %v4571_v57, %v850_v1  ;;  %v3478_v42 = vand.u32 8388607, %v4559_v53  ;;  %v297_v9 = vand.u32 2147483647, %v296_v7  ;;  %v299_v3 = vcvt.s32.f32 %v292_v14 }
 0x104   :  { %v585_v11 = vsel %vm583_vm11, %v584_v48, %v3454_v29  ;;  %v856_v27 = vshrl.u32 %v4569_v59, %v850_v1  ;;  %v701_v50 = vsub.s32 32, %v700_v16  ;;  %v858_v17 = vshll.u32 %v4569_v59, %v849_v51 }
 0x105   :  { %v586_v62 = vadd.s32 %v585_v11, %v581_v15  ;;  %v859_v39 = vshrl.u32 %v4567_v61, %v850_v1  ;;  %v848_v45 = vshrl.u32 %v847_v0, 5  ;;  %v854_v36 = vor.u32 %v853_v18, %v852_v52 }
 0x106   :  { %v857_v2 = vor.u32 %v856_v27, %v855_v44  ;;  %v861_v60 = vshll.u32 %v4567_v61, %v849_v51  ;;  %v862_v54 = vshrl.u32 %v3060_v63, %v850_v1  ;;  %v864_v14 = vshll.u32 %v3060_v63, %v849_v51 }
 0x107   :  { %v587_v47 = vadd.s32 536870912, %v586_v62  ;;  %v860_v58 = vor.u32 %v859_v39, %v858_v17  ;;  %v3487_v29 = vmul.f32 %v299_v3, %v297_v9  ;;  %v705_v7 = vsub.s32 4294967266, %v700_v16 }
 0x108   :  { %v865_v43 = vshrl.u32 %v4574_v8, %v850_v1  ;;  %v2802_v48 = vadd.s32 4294967169, %v736_v38  ;;  %v703_v15 = vshrl.u32 %v685_v25, %v701_v50  ;;  %v851_v0 = vshrl.u32 %v4576_v55, %v850_v1 }
 0x109   :  { %v3490_v11 = vshrl.u32 %v587_v47, 30  ;;  %v863_v52 = vor.u32 %v862_v54, %v861_v60  ;;  %vm867_vm12 = vcmp.lt.s32.totalorder %v848_v45, 1  ;;  %vm869_vm13 = vcmp.lt.s32.totalorder %v848_v45, 3  ;;  %v84_v60 = vpop.permute.xlu1 %83 }
 0x10a   :  { %v866_v44 = vor.u32 %v865_v43, %v864_v14  ;;  %vm870_vm14 = vcmp.lt.s32.totalorder %v848_v45, 4  ;;  %v875_v51 = vsel %vm867_vm12, %v854_v36, %v857_v2  ;;  %v706_v3 = vadd.s32 127, %v705_v7 }
 0x10b   :  { %4613 = vst [vmem:[#allocation13_spill] sm:$0xff] %v3490_v11  ;;  %v589_v18 = vshll.u32 %v3490_v11, 30  ;;  %v872_v27 = vsel %vm870_vm14, %v860_v58, 2102212464  ;;  %v876_v9 = vsel %vm870_vm14, %v863_v52, 920167782  ;;  %v879_v38 = vsel %vm867_vm12, %v857_v2, %v860_v58 }
 0x10c   :  { %vm868_vm15 = vcmp.lt.s32.totalorder %v848_v45, 2  ;;  %v877_v17 = vsel %vm869_vm13, %v860_v58, %v876_v9  ;;  %v871_v50 = vsel %vm867_vm12, %v851_v0, %v854_v36  ;;  %v880_v39 = vsel %vm870_vm14, %v866_v44, 1326507024 }
 0x10d   :  { %v3495_v25 = vsub.s32 %v586_v62, %v589_v18  ;;  %v878_v1 = vsel %vm868_vm15, %v875_v51, %v877_v17  ;;  %v873_v47 = vsel %vm869_vm13, %v857_v2, %v872_v27  ;;  %v881_v54 = vsel %vm869_vm13, %v863_v52, %v880_v39  ;;  %v3515_v2 = vld [vmem:[%s4555_s1] ss:$0 sm:$0xff]  ;;  %s3062_s1 = smov 64  }
 0x10e   :  { %v3501_v14 = vmul.u32.u64.low %v3467_v35, %v878_v1  ;;  %v3502_v43 = vmul.u32.u64.high %v3467_v35, %v878_v1, %v3501_v14  ;;  %v702_v7 = vshll.u32 %v3441_v4, %v700_v16  ;;  %v882_v62 = vsel %vm868_vm15, %v879_v38, %v881_v54 }
 0x10f   :  { %v592_v58 = vsub.s32 0, %v3495_v25  ;;  %v742_v36 = vadd.s32 1, %v2802_v48  ;;  %v707_v0 = vshll.u32 %v706_v3, 23  ;;  %v3518_v52 = vmul.f32 %v3515_v2, %v84_v60 }
 0x110   :  { %v3509_v44 = vmul.u32.u64.low %v3467_v35, %v882_v62  ;;  %v3510_v18 = vmul.u32.u64.high %v3467_v35, %v882_v62, %v3509_v44  ;;  %v3520_v27 = vor.u32 %v703_v15, %v702_v7  ;;  %v874_v16 = vsel %vm868_vm15, %v871_v50, %v873_v47 }
 0x111   :  { %v2795_v4 = vmin.u32 %v592_v58, %v3495_v25  ;;  %vm743_vm1 = vcmp.gt.s32.totalorder %v742_v36, 0  ;;  %v507_v48 = vxor.u32 2147483648, %v3421_v28  ;;  %v301_v51 = vxor.u32 2147483648, %v3487_v29 }
 0x112   :  { %v893_v9 = vadd.s32 1, %v3502_v43  ;;  %v744_v3 = vsel %vm743_vm1, %v742_v36, 0  ;;  %v740_v38 = vor.u32 8388608, %v3478_v42  ;;  %v4566_v39 = vand.u32 2147483647, %v3518_v52 }
 0x113   :  { %v594_v17 = vclz %v2795_v4  ;;  %v746_v1 = vand.u32 31, %v744_v3  ;;  %v3529_v15 = vor.u32 4788187, %v707_v0  ;;  %v582_v45 = vadd.s32 %v3453_v46, %v3459_v41 }
 0x114   :  { %v890_v50 = vmul.u32 %v3467_v35, %v874_v16  ;;  %vm892_vm2 = vc.u32 %v3510_v18, %v3501_v14  ;;  %v711_v60 = vcvt.s32.f32 %v3520_v27  ;;  %vm425_vm5 = vcmp.lt.s32.totalorder %v3119_v30, 0 }
 0x115   :  { %v2796_v47 = vadd.s32 4294967294, %v594_v17  ;;  %v894_v54 = vsel %vm892_vm2, %v893_v9, %v3502_v43  ;;  %v747_v7 = vsub.s32 32, %v746_v1  ;;  %v749_v58 = vshll.u32 %v4576_v55, %v746_v1 }
 0x116   :  { %v895_v42 = vadd.s32 %v894_v54, %v890_v50  ;;  %v752_v62 = vshll.u32 %v4571_v57, %v746_v1  ;;  %v755_v36 = vshll.u32 %v4569_v59, %v746_v1  ;;  %v758_v35 = vshll.u32 %v4567_v61, %v746_v1 }
 0x117   :  { %vm2797_vm3 = vcmp.lt.s32.totalorder %v2796_v47, 0  ;;  %v750_v46 = vshrl.u32 %v4571_v57, %v747_v7  ;;  %v753_v41 = vshrl.u32 %v4569_v59, %v747_v7  ;;  %v756_v27 = vshrl.u32 %v4567_v61, %v747_v7 }
 0x118   :  { %v597_v0 = vsel %vm2797_vm3, 0, %v2796_v47  ;;  %v896_v44 = vadd.s32 536870912, %v895_v42  ;;  %v759_v43 = vshrl.u32 %v3060_v63, %v747_v7  ;;  %v709_v4 = vand.u32 2147483647, %v3529_v15 }
 0x119   :  { %v602_v16 = vsub.s32 4294967266, %v597_v0  ;;  %v745_v9 = vshrl.u32 %v744_v3, 5  ;;  %v1044_v17 = vand.u32 2139095040, %v3518_v52  ;;  %v751_v54 = vor.u32 %v750_v46, %v749_v58 }
 0x11a   :  { %v3549_v50 = vshrl.u32 %v896_v44, 30  ;;  %v754_v53 = vor.u32 %v753_v41, %v752_v62  ;;  %v757_v6 = vor.u32 %v756_v27, %v755_v36  ;;  %v598_v22 = vsub.s32 32, %v597_v0 }
 0x11b   :  { %v760_v47 = vor.u32 %v759_v43, %v758_v35  ;;  %v761_v34 = vshll.u32 %v3060_v63, %v746_v1  ;;  %v762_v37 = vshrl.u32 %v4574_v8, %v747_v7  ;;  %vm219_vm6 = vcmp.lt.s32.totalorder %v3122_v32, 0 }
 0x11c   :  { %4614 = vst [vmem:[#allocation14_spill] sm:$0xff] %v3549_v50  ;;  %v603_v15 = vadd.s32 127, %v602_v16  ;;  %v898_v3 = vshll.u32 %v3549_v50, 30  ;;  %v780_v21 = vshll.u32 %v740_v38, 8  ;;  %v1048_v23 = vand.u32 8388607, %v4566_v39 }
 0x11d   :  { %v748_v44 = vshrl.u32 %v4576_v55, %v747_v7  ;;  %v763_v58 = vor.u32 %v762_v37, %v761_v34  ;;  %vm764_vm7 = vcmp.lt.s32.totalorder %v745_v9, 1  ;;  %vm767_vm8 = vcmp.lt.s32.totalorder %v745_v9, 4 }
 0x11e   :  { %v3558_v62 = vsub.s32 %v895_v42, %v898_v3  ;;  %v769_v1 = vsel %vm767_vm8, %v757_v6, 2102212464  ;;  %v772_v36 = vsel %vm764_vm7, %v751_v54, %v754_v53  ;;  %v1045_v46 = vshrl.u32 %v1044_v17, 23 }
 0x11f   :  { %v600_v41 = vshrl.u32 %v582_v45, %v598_v22  ;;  %vm765_vm9 = vcmp.lt.s32.totalorder %v745_v9, 2  ;;  %vm766_vm10 = vcmp.lt.s32.totalorder %v745_v9, 3  ;;  %v773_v35 = vsel %vm767_vm8, %v760_v47, 920167782 }
 0x120   :  { %v604_v38 = vshll.u32 %v603_v15, 23  ;;  %v901_v27 = vsub.s32 0, %v3558_v62  ;;  %v774_v43 = vsel %vm766_vm10, %v757_v6, %v773_v35  ;;  %v776_v16 = vsel %vm764_vm7, %v754_v53, %v757_v6 }
 0x121   :  { %v768_v7 = vsel %vm764_vm7, %v748_v44, %v751_v54  ;;  %v770_v34 = vsel %vm766_vm10, %v754_v53, %v769_v1  ;;  %v775_v37 = vsel %vm765_vm9, %v772_v36, %v774_v43  ;;  %v777_v42 = vsel %vm767_vm8, %v763_v58, 1326507024  ;;  %v80_v1 = vpop.permute.xlu0 %79 }
 0x122   :  { %v2807_v3 = vmin.u32 %v901_v27, %v3558_v62  ;;  %v778_v39 = vsel %vm766_vm10, %v760_v47, %v777_v42  ;;  %v3566_v17 = vmul.u32.u64.low %v780_v21, %v775_v37  ;;  %v3567_v22 = vmul.u32.u64.high %v780_v21, %v775_v37, %v3566_v17 }
 0x123   :  { %v3575_v45 = vsel %vm425_vm5, %v507_v48, %v3421_v28  ;;  %v3577_v6 = vmul.f32 %v711_v60, %v709_v4  ;;  %v779_v53 = vsel %vm765_vm9, %v776_v16, %v778_v39  ;;  %v2814_v54 = vadd.s32 4294967169, %v1045_v46 }
 0x124   :  { %v599_v15 = vshll.u32 %v3495_v25, %v597_v0  ;;  %v903_v44 = vclz %v2807_v3  ;;  %v3581_v47 = vmul.u32.u64.low %v780_v21, %v779_v53  ;;  %v3582_v58 = vmul.u32.u64.high %v780_v21, %v779_v53, %v3581_v47 }
 0x125   :  { %v3589_v36 = vsel %vm219_vm6, %v301_v51, %v3487_v29  ;;  %v771_v28 = vsel %vm765_vm9, %v768_v7, %v770_v34  ;;  %v1049_v48 = vor.u32 8388608, %v1048_v23  ;;  %v1051_v60 = vadd.s32 1, %v2814_v54 }
 0x126   :  { %v3592_v39 = vor.u32 %v600_v41, %v599_v15  ;;  %v3594_v4 = vor.u32 4788187, %v604_v38  ;;  %v2808_v25 = vadd.s32 4294967294, %v903_v44  ;;  %v790_v0 = vadd.s32 1, %v3567_v22 }
 0x127   :  { %v891_v35 = vadd.s32 %v3501_v14, %v3510_v18  ;;  %vm1052_vm11 = vcmp.gt.s32.totalorder %v1051_v60, 0  ;;  %v3601_v29 = vmul.f32 %v3515_v2, %v80_v1  ;;  %v787_v51 = vmul.u32 %v780_v21, %v771_v28 }
 0x128   :  { %vm2809_vm12 = vcmp.lt.s32.totalorder %v2808_v25, 0  ;;  %vm789_vm13 = vc.u32 %v3582_v58, %v3566_v17  ;;  %v1053_v23 = vsel %vm1052_vm11, %v1051_v60, 0  ;;  %v606_v43 = vand.u32 2147483647, %v3594_v4 }
 0x129   :  { %v906_v9 = vsel %vm2809_vm12, 0, %v2808_v25  ;;  %v791_v41 = vsel %vm789_vm13, %v790_v0, %v3567_v22  ;;  %v1055_v38 = vand.u32 31, %v1053_v23  ;;  %v4573_v27 = vand.u32 2147483647, %v3601_v29 }
 0x12a   :  { %v608_v14 = vcvt.s32.f32 %v3592_v39  ;;  %v792_v18 = vadd.s32 %v791_v41, %v787_v51  ;;  %v3609_v16 = vshll.u32 %v1049_v48, 8  ;;  %v907_v42 = vsub.s32 32, %v906_v9 }
 0x12b   :  { %v1056_v7 = vsub.s32 32, %v1055_v38  ;;  %v1058_v21 = vshll.u32 %v4576_v55, %v1055_v38  ;;  %v1061_v34 = vshll.u32 %v4571_v57, %v1055_v38  ;;  %v1064_v37 = vshll.u32 %v4569_v59, %v1055_v38 }
 0x12c   :  { %v793_v3 = vadd.s32 536870912, %v792_v18  ;;  %v1067_v22 = vshll.u32 %v4567_v61, %v1055_v38  ;;  %v941_v53 = vand.u32 2139095040, %v3601_v29  ;;  %v911_v54 = vsub.s32 4294967266, %v906_v9 }
 0x12d   :  { %v1059_v15 = vshrl.u32 %v4571_v57, %v1056_v7  ;;  %v1062_v44 = vshrl.u32 %v4569_v59, %v1056_v7  ;;  %v1065_v47 = vshrl.u32 %v4567_v61, %v1056_v7  ;;  %v1054_v28 = vshrl.u32 %v1053_v23, 5 }
 0x12e   :  { %v3619_v1 = vshrl.u32 %v793_v3, 30  ;;  %v1068_v48 = vshrl.u32 %v3060_v63, %v1056_v7  ;;  %v3624_v60 = vand.u32 8388607, %v4573_v27  ;;  %vm631_vm14 = vcmp.lt.s32.totalorder %v3263_v49, 0 }
 0x12f   :  { %v1060_v39 = vor.u32 %v1059_v15, %v1058_v21  ;;  %v1063_v4 = vor.u32 %v1062_v44, %v1061_v34  ;;  %v1066_v25 = vor.u32 %v1065_v47, %v1064_v37  ;;  %v1070_v0 = vshll.u32 %v3060_v63, %v1055_v38 }
 0x130   :  { %4615 = vst [vmem:[#allocation15_spill] sm:$0xff] %v3619_v1  ;;  %v909_v51 = vshrl.u32 %v891_v35, %v907_v42  ;;  %v795_v41 = vshll.u32 %v3619_v1, 30  ;;  %v1069_v61 = vor.u32 %v1068_v48, %v1067_v22  ;;  %v942_v3 = vshrl.u32 %v941_v53, 23 }
 0x131   :  { %v908_v23 = vshll.u32 %v3558_v62, %v906_v9  ;;  %v912_v59 = vadd.s32 127, %v911_v54  ;;  %v1057_v57 = vshrl.u32 %v4576_v55, %v1056_v7  ;;  %v1071_v27 = vshrl.u32 %v4574_v8, %v1056_v7 }
 0x132   :  { %v3632_v46 = vsub.s32 %v792_v18, %v795_v41  ;;  %vm1073_vm15 = vcmp.lt.s32.totalorder %v1054_v28, 1  ;;  %vm1075_vm1 = vcmp.lt.s32.totalorder %v1054_v28, 3  ;;  %vm1076_vm2 = vcmp.lt.s32.totalorder %v1054_v28, 4 }
 0x133   :  { %v1072_v21 = vor.u32 %v1071_v27, %v1070_v0  ;;  %v1078_v34 = vsel %vm1076_vm2, %v1066_v25, 2102212464  ;;  %v1081_v35 = vsel %vm1073_vm15, %v1060_v39, %v1063_v4  ;;  %v1082_v38 = vsel %vm1076_vm2, %v1069_v61, 920167782  ;;  %v95_v0 = vpop.permute.xlu1 %94 }
 0x134   :  { %v3635_v37 = vor.u32 %v909_v51, %v908_v23  ;;  %v798_v42 = vsub.s32 0, %v3632_v46  ;;  %vm1074_vm3 = vcmp.lt.s32.totalorder %v1054_v28, 2  ;;  %v1083_v62 = vsel %vm1075_vm1, %v1066_v25, %v1082_v38  ;;  %v91_v51 = vpop.permute.xlu0 %90 }
 0x135   :  { %v913_v9 = vshll.u32 %v912_v59, 23  ;;  %v1084_v7 = vsel %vm1074_vm3, %v1081_v35, %v1083_v62  ;;  %v1085_v18 = vsel %vm1073_vm15, %v1063_v4, %v1066_v25  ;;  %v1086_v22 = vsel %vm1076_vm2, %v1072_v21, 1326507024 }
 0x136   :  { %v2803_v53 = vmin.u32 %v798_v42, %v3632_v46  ;;  %v1077_v27 = vsel %vm1073_vm15, %v1057_v57, %v1060_v39  ;;  %v1079_v54 = vsel %vm1075_vm1, %v1063_v4, %v1078_v34  ;;  %v1087_v15 = vsel %vm1075_vm1, %v1069_v61, %v1086_v22 }
 0x137   :  { %v1088_v44 = vsel %vm1074_vm3, %v1085_v18, %v1087_v15  ;;  %v3647_v47 = vmul.u32.u64.low %v3609_v16, %v1084_v7  ;;  %v3648_v48 = vmul.u32.u64.high %v3609_v16, %v1084_v7, %v3647_v47  ;;  %v2810_v59 = vadd.s32 4294967169, %v942_v3 }
 0x138   :  { %v4616_v25 = vxor.u32 2147483648, %v3577_v6  ;;  %v800_v39 = vclz %v2803_v53  ;;  %v3659_v61 = vmul.u32.u64.low %v3609_v16, %v1088_v44  ;;  %v3660_v4 = vmul.u32.u64.high %v3609_v16, %v1088_v44, %v3659_v61 }
 0x139   :  { %v3662_v41 = vmul.f32 %v608_v14, %v606_v43  ;;  %v3664_v23 = vor.u32 4788187, %v913_v9  ;;  %v1080_v3 = vsel %vm1074_vm3, %v1077_v27, %v1079_v54  ;;  %v948_v21 = vadd.s32 1, %v2810_v59 }
 0x13a   :  { %v3656_v57 = vsel %vm631_vm14, %v4616_v25, %v3577_v6  ;;  %v2804_v34 = vadd.s32 4294967294, %v800_v39  ;;  %v946_v35 = vor.u32 8388608, %v3624_v60  ;;  %v3669_v38 = vmul.f32 %v3515_v2, %v95_v0 }
 0x13b   :  { %4617 = vst [vmem:[#allocation16_spill] sm:$0xff] %v3656_v57  ;;  %v3672_v6 = vmul.f32 %v3515_v2, %v91_v51  ;;  %v788_v43 = vadd.s32 %v3566_v17, %v3582_v58  ;;  %v1099_v14 = vadd.s32 1, %v3648_v48  ;;  %vm949_vm7 = vcmp.gt.s32.totalorder %v948_v21, 0 }
 0x13c   :  { %vm2805_vm8 = vcmp.lt.s32.totalorder %v2804_v34, 0  ;;  %v1096_v28 = vmul.u32 %v3609_v16, %v1080_v3  ;;  %vm1098_vm9 = vc.u32 %v3660_v4, %v3647_v47  ;;  %v950_v60 = vsel %vm949_vm7, %v948_v21, 0 }
 0x13d   :  { %v803_v9 = vsel %vm2805_vm8, 0, %v2804_v34  ;;  %v1100_v2 = vsel %vm1098_vm9, %v1099_v14, %v3648_v48  ;;  %v952_v7 = vand.u32 31, %v950_v60  ;;  %v3683_v53 = vshll.u32 %v946_v35, 8 }
 0x13e   :  { %v808_v18 = vsub.s32 4294967266, %v803_v9  ;;  %v1101_v22 = vadd.s32 %v1100_v2, %v1096_v28  ;;  %v4618_v16 = vmov 2475754826   ;;  %v4619_v15 = vmov 2131351028  }
 0x13f   :  { %v953_v58 = vsub.s32 32, %v952_v7  ;;  %v955_v27 = vshll.u32 %v4576_v55, %v952_v7  ;;  %v958_v54 = vshll.u32 %v4618_v16, %v952_v7  ;;  %v961_v44 = vshll.u32 %v4619_v15, %v952_v7 }
 0x140   :  { %v804_v59 = vsub.s32 32, %v803_v9  ;;  %v1102_v0 = vadd.s32 536870912, %v1101_v22  ;;  %v4620_v51 = vmov 2102212464   ;;  %v1250_v48 = vand.u32 2139095040, %v3669_v38 }
 0x141   :  { %v964_v25 = vshll.u32 %v4620_v51, %v952_v7  ;;  %v809_v39 = vadd.s32 127, %v808_v18  ;;  %v956_v61 = vshrl.u32 %v4618_v16, %v953_v58  ;;  %v959_v3 = vshrl.u32 %v4619_v15, %v953_v58 }
 0x142   :  { %v962_v21 = vshrl.u32 %v4620_v51, %v953_v58  ;;  %v3694_v34 = vshrl.u32 %v1102_v0, 30  ;;  %v951_v35 = vshrl.u32 %v950_v60, 5  ;;  %v965_v14 = vshrl.u32 %v3060_v63, %v953_v58 }
 0x143   :  { %v4588_v28 = vand.u32 2147483647, %v3672_v6  ;;  %v957_v2 = vor.u32 %v956_v61, %v955_v27  ;;  %v960_v42 = vor.u32 %v959_v3, %v958_v54  ;;  %v967_v17 = vshll.u32 %v3060_v63, %v952_v7 }
 0x144   :  { %v963_v62 = vor.u32 %v962_v21, %v961_v44  ;;  %v806_v8 = vshrl.u32 %v788_v43, %v804_v59  ;;  %v1104_v18 = vshll.u32 %v3694_v34, 30  ;;  %v966_v55 = vor.u32 %v965_v14, %v964_v25 }
 0x145   :  { %v1147_v50 = vand.u32 2139095040, %v3672_v6  ;;  %v805_v1 = vshll.u32 %v3632_v46, %v803_v9  ;;  %v810_v0 = vshll.u32 %v809_v39, 23  ;;  %v4621_v57 = vmov 683565275  }
 0x146   :  { %v954_v60 = vshrl.u32 %v4621_v57, %v953_v58  ;;  %v4622_v49 = vmov 1326507024   ;;  %v3704_v11 = vsub.s32 %v1101_v22, %v1104_v18  ;;  %vm970_vm10 = vcmp.lt.s32.totalorder %v951_v35, 1 }
 0x147   :  { %v968_v24 = vshrl.u32 %v4622_v49, %v953_v58  ;;  %vm972_vm11 = vcmp.lt.s32.totalorder %v951_v35, 3  ;;  %vm973_vm12 = vcmp.lt.s32.totalorder %v951_v35, 4  ;;  %v978_v43 = vsel %vm970_vm10, %v957_v2, %v960_v42 }
 0x148   :  { %v975_v7 = vsel %vm973_vm12, %v963_v62, 2102212464  ;;  %v979_v54 = vsel %vm973_vm12, %v966_v55, 920167782  ;;  %v807_v44 = vor.u32 %v806_v8, %v805_v1  ;;  %v1107_v59 = vsub.s32 0, %v3704_v11 }
 0x149   :  { %v969_v27 = vor.u32 %v968_v24, %v967_v17  ;;  %vm971_vm13 = vcmp.lt.s32.totalorder %v951_v35, 2  ;;  %v980_v46 = vsel %vm972_vm11, %v963_v62, %v979_v54  ;;  %v811_v9 = vor.u32 4788187, %v810_v0 }
 0x14a   :  { %v981_v25 = vsel %vm971_vm13, %v978_v43, %v980_v46  ;;  %v982_v22 = vsel %vm970_vm10, %v960_v42, %v963_v62  ;;  %v2815_v39 = vmin.u32 %v1107_v59, %v3704_v11  ;;  %v974_v24 = vsel %vm970_vm10, %v954_v60, %v957_v2 }
 0x14b   :  { %v983_v58 = vsel %vm973_vm12, %v969_v27, 1326507024  ;;  %v976_v17 = vsel %vm972_vm11, %v960_v42, %v975_v7  ;;  %v3717_v1 = vmul.u32.u64.low %v3683_v53, %v981_v25  ;;  %v3718_v3 = vmul.u32.u64.high %v3683_v53, %v981_v25, %v3717_v1 }
 0x14c   :  { %v984_v61 = vsel %vm972_vm11, %v966_v55, %v983_v58  ;;  %v1251_v21 = vshrl.u32 %v1250_v48, 23  ;;  %v1109_v14 = vclz %v2815_v39  ;;  %v4623_v0 = vand.u32 2147483647, %v3669_v38 }
 0x14d   :  { %v985_v8 = vsel %vm971_vm13, %v982_v22, %v984_v61  ;;  %v610_v2 = vxor.u32 2147483648, %v3662_v41  ;;  %v977_v42 = vsel %vm971_vm13, %v974_v24, %v976_v17  ;;  %v1148_v60 = vshrl.u32 %v1147_v50, 23 }
 0x14e   :  { %v3721_v18 = vmul.u32.u64.low %v3683_v53, %v985_v8  ;;  %v3722_v62 = vmul.u32.u64.high %v3683_v53, %v985_v8, %v3721_v18  ;;  %v1254_v27 = vand.u32 8388607, %v4623_v0  ;;  %v2822_v55 = vadd.s32 4294967169, %v1251_v21 }
 0x14f   :  { %v4624_v7 = vand.u32 2147483647, %v3664_v23  ;;  %v4625_v43 = vcvt.s32.f32 %v3635_v37  ;;  %v814_v48 = vcvt.s32.f32 %v807_v44  ;;  %v2816_v59 = vadd.s32 4294967294, %v1109_v14 }
 0x150   :  { %v1151_v46 = vand.u32 8388607, %v4588_v28  ;;  %v812_v25 = vand.u32 2147483647, %v811_v9  ;;  %v996_v22 = vadd.s32 1, %v3718_v3  ;;  %v1257_v58 = vadd.s32 1, %v2822_v55 }
 0x151   :  { %v3732_v54 = vmul.f32 %v4625_v43, %v4624_v7  ;;  %v2818_v39 = vadd.s32 4294967169, %v1148_v60  ;;  %vm2817_vm15 = vcmp.lt.s32.totalorder %v2816_v59, 0  ;;  %v993_v35 = vmul.u32 %v3683_v53, %v977_v42 }
 0x152   :  { %vm995_vm1 = vc.u32 %v3722_v62, %v3717_v1  ;;  %v1255_v50 = vor.u32 8388608, %v1254_v27  ;;  %v1112_v23 = vsel %vm2817_vm15, 0, %v2816_v59  ;;  %vm1258_vm2 = vcmp.gt.s32.totalorder %v1257_v58, 0 }
 0x153   :  { %v997_v37 = vsel %vm995_vm1, %v996_v22, %v3718_v3  ;;  %v1154_v44 = vadd.s32 1, %v2818_v39  ;;  %v1113_v24 = vsub.s32 32, %v1112_v23  ;;  %v1117_v17 = vsub.s32 4294967266, %v1112_v23 }
 0x154   :  { %v998_v61 = vadd.s32 %v997_v37, %v993_v35  ;;  %v1152_v8 = vor.u32 8388608, %v1151_v46  ;;  %v3741_v21 = vmul.f32 %v814_v48, %v812_v25  ;;  %v1097_v14 = vadd.s32 %v3647_v47, %v3660_v4 }
 0x155   :  { %v1259_v53 = vsel %vm1258_vm2, %v1257_v58, 0  ;;  %v1118_v18 = vadd.s32 127, %v1117_v17  ;;  %v3745_v27 = vshll.u32 %v1255_v50, 8  ;;  %v200_v3 = vsub.s32 4, %v3239_v10 }
 0x156   :  { %v999_v0 = vadd.s32 536870912, %v998_v61  ;;  %v1115_v42 = vshrl.u32 %v1097_v14, %v1113_v24  ;;  %v3749_v55 = vadd.s32 %v3717_v1, %v3722_v62  ;;  %v1261_v60 = vand.u32 31, %v1259_v53 }
 0x157   :  { %vm1155_vm3 = vcmp.gt.s32.totalorder %v1154_v44, 0  ;;  %v1114_v7 = vshll.u32 %v3704_v11, %v1112_v23  ;;  %v1260_v48 = vshrl.u32 %v1259_v53, 5  ;;  %v3754_v59 = vshll.u32 %v1152_v8, 8 }
 0x158   :  { %v3752_v43 = vshrl.u32 %v999_v0, 30  ;;  %v1262_v47 = vsub.s32 32, %v1261_v60  ;;  %v1264_v4 = vshll.u32 %v4621_v57, %v1261_v60  ;;  %v1267_v46 = vshll.u32 %v4618_v16, %v1261_v60 }
 0x159   :  { %v1270_v25 = vshll.u32 %v4619_v15, %v1261_v60  ;;  %v1119_v22 = vshll.u32 %v1118_v18, 23  ;;  %v1273_v62 = vshll.u32 %v4620_v51, %v1261_v60  ;;  %v1156_v58 = vsel %vm1155_vm3, %v1154_v44, 0 }
 0x15a   :  { %v1001_v1 = vshll.u32 %v3752_v43, 30  ;;  %v1116_v39 = vor.u32 %v1115_v42, %v1114_v7  ;;  %v1265_v11 = vshrl.u32 %v4618_v16, %v1262_v47  ;;  %v1268_v35 = vshrl.u32 %v4619_v15, %v1262_v47 }
 0x15b   :  { %v1271_v50 = vshrl.u32 %v4620_v51, %v1262_v47  ;;  %v1263_v37 = vshrl.u32 %v4621_v57, %v1262_v47  ;;  %v1274_v24 = vshrl.u32 %v3060_v63, %v1262_v47  ;;  %v1276_v17 = vshll.u32 %v3060_v63, %v1261_v60 }
 0x15c   :  { %v3764_v23 = vsub.s32 %v998_v61, %v1001_v1  ;;  %v1266_v8 = vor.u32 %v1265_v11, %v1264_v4  ;;  %v1269_v14 = vor.u32 %v1268_v35, %v1267_v46  ;;  %v1277_v44 = vshrl.u32 %v4622_v49, %v1262_v47 }
 0x15d   :  { %v1272_v53 = vor.u32 %v1271_v50, %v1270_v25  ;;  %v4626_v18 = vand.u32 2147483647, %v3108_v20  ;;  %v1120_v42 = vor.u32 4788187, %v1119_v22  ;;  %v1275_v7 = vor.u32 %v1274_v24, %v1273_v62 }
 0x15e   :  { %v1004_v61 = vsub.s32 0, %v3764_v23  ;;  %vm1279_vm8 = vcmp.lt.s32.totalorder %v1260_v48, 1  ;;  %v1123_v1 = vcvt.s32.f32 %v1116_v39  ;;  %v1278_v28 = vor.u32 %v1277_v44, %v1276_v17 }
 0x15f   :  { %vm3772_vm7 = vcmp.le.f32.partialorder %v4626_v18, 0.7853982  ;;  %vm1281_vm9 = vcmp.lt.s32.totalorder %v1260_v48, 3  ;;  %vm1282_vm10 = vcmp.lt.s32.totalorder %v1260_v48, 4  ;;  %v1283_v4 = vsel %vm1279_vm8, %v1263_v37, %v1266_v8 }
 0x160   :  { %v2811_v60 = vmin.u32 %v1004_v61, %v3764_v23  ;;  %v1284_v46 = vsel %vm1282_vm10, %v1272_v53, 2102212464  ;;  %v1287_v47 = vsel %vm1279_vm8, %v1266_v8, %v1269_v14  ;;  %v1288_v11 = vsel %vm1282_vm10, %v1275_v7, 920167782 }
 0x161   :  { %v1285_v25 = vsel %vm1281_vm9, %v1269_v14, %v1284_v46  ;;  %v1291_v35 = vsel %vm1279_vm8, %v1269_v14, %v1272_v53  ;;  %v1292_v50 = vsel %vm1282_vm10, %v1278_v28, 1326507024  ;;  %v1121_v18 = vand.u32 2147483647, %v1120_v42 }
 0x162   :  { %v1006_v22 = vclz %v2811_v60  ;;  %vm1280_vm11 = vcmp.lt.s32.totalorder %v1260_v48, 2  ;;  %v1289_v62 = vsel %vm1281_vm9, %v1272_v53, %v1288_v11  ;;  %v1293_v17 = vsel %vm1281_vm9, %v1275_v7, %v1292_v50 }
 0x163   :  { %v1286_v24 = vsel %vm1280_vm11, %v1283_v4, %v1285_v25  ;;  %v1290_v39 = vsel %vm1280_vm11, %v1287_v47, %v1289_v62  ;;  %v3781_v44 = vshrl.u32 %v1156_v58, 5  ;;  %v1294_v37 = vsel %vm1280_vm11, %v1291_v35, %v1293_v17 }
 0x164   :  { %v2812_v61 = vadd.s32 4294967294, %v1006_v22  ;;  %v3784_v8 = vmul.u32.u64.low %v3745_v27, %v1290_v39  ;;  %v3785_v9 = vmul.u32.u64.high %v3745_v27, %v1290_v39, %v3784_v8  ;;  %v1158_v42 = vand.u32 31, %v1156_v58 }
 0x165   :  { %v3789_v28 = vmul.u32.u64.low %v3745_v27, %v1294_v37  ;;  %v3790_v14 = vmul.u32.u64.high %v3745_v27, %v1294_v37, %v3789_v28  ;;  %v3795_v53 = vsel %vm116_vm4, %v200_v3, %v3239_v10  ;;  %v3797_v48 = vmul.f32 %v1123_v1, %v1121_v18 }
 0x166   :  { %vm2813_vm12 = vcmp.lt.s32.totalorder %v2812_v61, 0  ;;  %v1302_v7 = vmul.u32 %v3745_v27, %v1286_v24  ;;  %v202_v60 = vsel %vm3772_vm7, %v3108_v20, %v3412_v12  ;;  %v1159_v46 = vsub.s32 32, %v1158_v42 }
 0x167   :  { %v1009_v4 = vsel %vm2813_vm12, 0, %v2812_v61  ;;  %v1161_v47 = vshll.u32 %v4621_v57, %v1158_v42  ;;  %vm1176_vm13 = vcmp.lt.s32.totalorder %v3781_v44, 1  ;;  %v1305_v10 = vadd.s32 1, %v3785_v9 }
 0x168   :  { %v1010_v58 = vsub.s32 32, %v1009_v4  ;;  %v1014_v25 = vsub.s32 4294967266, %v1009_v4  ;;  %v1164_v3 = vshll.u32 %v4618_v16, %v1158_v42  ;;  %v1011_v1 = vshll.u32 %v3764_v23, %v1009_v4 }
 0x169   :  { %vm1304_vm4 = vc.u32 %v3790_v14, %v3784_v8  ;;  %v1160_v27 = vshrl.u32 %v4621_v57, %v1159_v46  ;;  %v1162_v12 = vshrl.u32 %v4618_v16, %v1159_v46  ;;  %v1165_v18 = vshrl.u32 %v4619_v15, %v1159_v46 }
 0x16a   :  { %v1012_v11 = vshrl.u32 %v3749_v55, %v1010_v58  ;;  %v1015_v35 = vadd.s32 127, %v1014_v25  ;;  %v1306_v50 = vsel %vm1304_vm4, %v1305_v10, %v3785_v9  ;;  %vm1177_vm15 = vcmp.lt.s32.totalorder %v3781_v44, 2 }
 0x16b   :  { %v1307_v22 = vadd.s32 %v1306_v50, %v1302_v7  ;;  %v1163_v62 = vor.u32 %v1162_v12, %v1161_v47  ;;  %v1167_v23 = vshll.u32 %v4619_v15, %v1158_v42  ;;  %v1168_v24 = vshrl.u32 %v4620_v51, %v1159_v46 }
 0x16c   :  { %v1013_v39 = vor.u32 %v1012_v11, %v1011_v1  ;;  %v1016_v17 = vshll.u32 %v1015_v35, 23  ;;  %v1166_v57 = vor.u32 %v1165_v18, %v1164_v3  ;;  %v1170_v16 = vshll.u32 %v4620_v51, %v1158_v42 }
 0x16d   :  { %vm528_vm1 = vcmp.lt.s32.totalorder %v3345_v33, 0  ;;  %v1308_v55 = vadd.s32 536870912, %v1307_v22  ;;  %v1169_v61 = vor.u32 %v1168_v24, %v1167_v23  ;;  %v1171_v9 = vshrl.u32 %v3060_v63, %v1159_v46 }
 0x16e   :  { %v1173_v37 = vshll.u32 %v3060_v63, %v1158_v42  ;;  %vm837_vm2 = vcmp.lt.s32.totalorder %v3353_v40, 0  ;;  %v1017_v28 = vor.u32 4788187, %v1016_v17  ;;  %v1174_v15 = vshrl.u32 %v4622_v49, %v1159_v46 }
 0x16f   :  { %vm1178_vm3 = vcmp.lt.s32.totalorder %v3781_v44, 3  ;;  %vm1179_vm8 = vcmp.lt.s32.totalorder %v3781_v44, 4  ;;  %vm734_vm9 = vcmp.lt.s32.totalorder %v3419_v5, 0  ;;  %v1020_v51 = vcvt.s32.f32 %v1013_v39 }
 0x170   :  { %v3828_v7 = vshrl.u32 %v1308_v55, 30  ;;  %v1172_v4 = vor.u32 %v1171_v9, %v1170_v16  ;;  %v1181_v47 = vsel %vm1179_vm8, %v1169_v61, 2102212464  ;;  %v1018_v58 = vand.u32 2147483647, %v1017_v28 }
 0x171   :  { %v1175_v63 = vor.u32 %v1174_v15, %v1173_v37  ;;  %v1180_v42 = vsel %vm1176_vm13, %v1160_v27, %v1163_v62  ;;  %v1184_v49 = vsel %vm1176_vm13, %v1163_v62, %v1166_v57  ;;  %vm1043_vm10 = vcmp.lt.s32.totalorder %v3518_v52, 0 }
 0x172   :  { %v1310_v46 = vshll.u32 %v3828_v7, 30  ;;  %v1185_v25 = vsel %vm1179_vm8, %v1172_v4, 920167782  ;;  %v1188_v10 = vsel %vm1176_vm13, %v1166_v57, %v1169_v61  ;;  %2934 = vcosq.f32 %v202_v60 }
 0x173   :  { %vm940_vm11 = vcmp.lt.s32.totalorder %v3601_v29, 0  ;;  %v1021_v3 = vmul.f32 %v1020_v51, %v1018_v58  ;;  %v1182_v1 = vsel %vm1178_vm3, %v1166_v57, %v1181_v47  ;;  %v1186_v27 = vsel %vm1178_vm3, %v1169_v61, %v1185_v25 }
 0x174   :  { %v1189_v12 = vsel %vm1179_vm8, %v1175_v63, 1326507024  ;;  %v3849_v11 = vsub.s32 %v1307_v22, %v1310_v46  ;;  %v1187_v35 = vsel %vm1177_vm15, %v1184_v49, %v1186_v27  ;;  %2936 = vsinq.f32 %v202_v60 }
 0x175   :  { %v1190_v50 = vsel %vm1178_vm3, %v1172_v4, %v1189_v12  ;;  %v816_v18 = vxor.u32 2147483648, %v3741_v21  ;;  %v3859_v23 = vmul.u32.u64.low %v3754_v59, %v1187_v35  ;;  %v3860_v24 = vmul.u32.u64.high %v3754_v59, %v1187_v35, %v3859_v23 }
 0x176   :  { %v1191_v62 = vsel %vm1177_vm15, %v1188_v10, %v1190_v50  ;;  %v1313_v39 = vsub.s32 0, %v3849_v11  ;;  %v3870_v57 = vsel %vm3772_vm7, 0, %v3795_v53  ;;  %v3877_v60 = vsel %vm528_vm1, %v610_v2, %v3662_v41 }
 0x177   :  { %v3864_v22 = vmul.u32.u64.low %v3754_v59, %v1191_v62  ;;  %v3865_v17 = vmul.u32.u64.high %v3754_v59, %v1191_v62, %v3864_v22  ;;  %v1125_v16 = vxor.u32 2147483648, %v3797_v48  ;;  %v1183_v55 = vsel %vm1177_vm15, %v1180_v42, %v1182_v1 }
 0x178   :  { %v406_v61 = vsub.s32 4, %v3208_v31  ;;  %v4629_v9 = vxor.u32 2147483648, %v3732_v54  ;;  %v1022_v53 = vxor.u32 2147483648, %v1021_v3  ;;  %v2823_v37 = vmin.u32 %v1313_v39, %v3849_v11 }
 0x179   :  { %v4630_v41 = vand.u32 2147483647, %v3105_v19  ;;  %v3900_v44 = vsel %vm734_vm9, %v816_v18, %v3741_v21  ;;  %v1202_v28 = vadd.s32 1, %v3860_v24  ;;  %v207_v15 = vand.u32 3, %v3870_v57 }
 0x17a   :  { %v3888_v0 = vsel %vm837_vm2, %v4629_v9, %v3732_v54  ;;  %v1315_v51 = vclz %v2823_v37  ;;  %v1199_v4 = vmul.u32 %v3754_v59, %v1183_v55  ;;  %vm1201_vm12 = vc.u32 %v3865_v17, %v3859_v23 }
 0x17b   :  { %vm3893_vm7 = vcmp.le.f32.partialorder %v4630_v41, 0.7853982  ;;  %vm4590_vm13 = vweird.f32 %v3108_v20  ;;  %v407_v21 = vsel %vm322_vm0, %v406_v61, %v3208_v31  ;;  %v3917_v47 = vsel %vm1043_vm10, %v1125_v16, %v3797_v48 }
 0x17c   :  { %v408_v54 = vsel %vm3893_vm7, %v3105_v19, %v3406_v56  ;;  %v1303_v58 = vadd.s32 %v3784_v8, %v3790_v14  ;;  %v1203_v56 = vsel %vm1201_vm12, %v1202_v28, %v3860_v24  ;;  %v3922_v59 = vpop.eup %2934  ;;  %v3926_v63 = vsel %vm940_vm11, %v1022_v53, %v1021_v3 }
 0x17d   :  { %2938 = vcosq.f32 %v408_v54  ;;  %v2824_v42 = vadd.s32 4294967294, %v1315_v51  ;;  %v1204_v49 = vadd.s32 %v1203_v56, %v1199_v4  ;;  %vm212_vm0 = vcmp.eq.s32.totalorder %v207_v15, 2 }
 0x17e   :  { %2940 = vsinq.f32 %v408_v54  ;;  %v213_v31 = vxor.u32 2147483648, %v3922_v59  ;;  %v3931_v48 = vsel %vm3893_vm7, 0, %v407_v21  ;;  %v4633_v8 = vand.u32 2147483647, %v3122_v32  ;;  %v3939_v46 = vpop.eup %2936 }
 0x17f   :  { %vm2825_vm15 = vcmp.lt.s32.totalorder %v2824_v42, 0  ;;  %v1205_v25 = vadd.s32 536870912, %v1204_v49  ;;  %v303_v10 = vsub.s32 4, %v3360_v13  ;;  %vm209_vm3 = vcmp.eq.s32.totalorder %v207_v15, 0 }
 0x180   :  { %vm3935_vm4 = vcmp.le.f32.partialorder %v4633_v8, 0.7853982  ;;  %v1318_v1 = vsel %vm2825_vm15, 0, %v2824_v42  ;;  %v210_v27 = vxor.u32 2147483648, %v3939_v46  ;;  %v214_v12 = vsel %vm212_vm0, %v213_v31, %v3939_v46 }
 0x181   :  { %v305_v3 = vsel %vm3935_vm4, %v3122_v32, %v3589_v36  ;;  %v1319_v35 = vsub.s32 32, %v1318_v1  ;;  %v1323_v50 = vsub.s32 4294967266, %v1318_v1  ;;  %v3950_v18 = vshrl.u32 %v1205_v25, 30 }
 0x182   :  { %v413_v62 = vand.u32 3, %v3931_v48  ;;  %vm208_vm8 = vcmp.lt.s32.totalorder %v207_v15, 2  ;;  %v211_v24 = vsel %vm209_vm3, %v3922_v59, %v210_v27  ;;  %vm2598_vm7 = vcmask 523264  }
 0x183   :  { %2942 = vcosq.f32 %v305_v3  ;;  %v1324_v36 = vadd.s32 127, %v1323_v50  ;;  %v1207_v39 = vshll.u32 %v3950_v18, 30  ;;  %v215_v22 = vsel %vm208_vm8, %v211_v24, %v214_v12 }
 0x184   :  { %vm4589_vm12 = vweird.f32 %v3105_v19  ;;  %v304_v16 = vsel %vm219_vm6, %v303_v10, %v3360_v13  ;;  %v1321_v55 = vshrl.u32 %v1303_v58, %v1319_v35  ;;  %v3962_v61 = vadd.s32 %v3859_v23, %v3865_v17 }
 0x185   :  { %v216_v9 = vsel %vm4590_vm13, nan, %v215_v22  ;;  %2944 = vsinq.f32 %v305_v3  ;;  %v1325_v53 = vshll.u32 %v1324_v36, 23  ;;  %v3966_v37 = vsub.s32 %v1204_v49, %v1207_v39 }
 0x186   :  { %2623 = vrot.lane.b32.xlu0 %v216_v9, %s3062_s1  ;;  %2599 = vst.msk [vmem:[#allocation5] sm:$0xff] %vm2598_vm7, %v216_v9  ;;  %vm414_vm0 = vcmp.lt.s32.totalorder %v413_v62, 2  ;;  %vm415_vm15 = vcmp.eq.s32.totalorder %v413_v62, 0  ;;  %v1320_v13 = vshll.u32 %v3849_v11, %v1318_v1  ;;  %vm418_vm6 = vcmp.eq.s32.totalorder %v413_v62, 2 }
 0x187   :  { %v3970_v41 = vpop.eup %2938  ;;  %v3975_v23 = vsel %vm3935_vm4, 0, %v304_v16  ;;  %v509_v17 = vsub.s32 4, %v3286_v26  ;;  %v1326_v28 = vor.u32 4788187, %v1325_v53  ;;  %v1210_v15 = vsub.s32 0, %v3966_v37 }
 0x188   :  { %v3978_v2 = vpop.eup %2940  ;;  %v419_v54 = vxor.u32 2147483648, %v3970_v41  ;;  %v4636_v51 = vand.u32 2147483647, %v3119_v30  ;;  %v1322_v4 = vor.u32 %v1321_v55, %v1320_v13  ;;  %v310_v49 = vand.u32 3, %v3975_v23 }
 0x189   :  { %v416_v11 = vxor.u32 2147483648, %v3978_v2  ;;  %v510_v21 = vsel %vm425_vm5, %v509_v17, %v3286_v26  ;;  %v2819_v56 = vmin.u32 %v1210_v15, %v3966_v37  ;;  %v1327_v14 = vand.u32 2147483647, %v1326_v28  ;;  %v4637_v26 = vld [vmem:[#allocation13_spill] sm:$0xff]  ;;  %v4641_v17 = vld [vmem:[#allocation12_spill] sm:$0xff] }
 0x18a   :  { %vm424_vm3 = vcmp.le.f32.partialorder %v4636_v51, 0.7853982  ;;  %v420_v42 = vsel %vm418_vm6, %v419_v54, %v3978_v2  ;;  %v612_v10 = vsub.s32 4, %v4637_v26  ;;  %vm309_vm5 = vweird.f32 %v3122_v32 }
 0x18b   :  { %v511_v58 = vsel %vm424_vm3, %v3119_v30, %v3575_v45  ;;  %v3995_v8 = vsel %vm424_vm3, 0, %v510_v21  ;;  %v417_v25 = vsel %vm415_vm15, %v3970_v41, %v416_v11  ;;  %v1212_v45 = vclz %v2819_v56 }
 0x18c   :  { %2946 = vcosq.f32 %v511_v58  ;;  %v421_v3 = vsel %vm414_vm0, %v417_v25, %v420_v42  ;;  %v1329_v12 = vcvt.s32.f32 %v1322_v4  ;;  %v516_v50 = vand.u32 3, %v3995_v8  ;;  %v4642_v25 = vld [vmem:[#allocation11_spill] sm:$0xff] }
 0x18d   :  { %2948 = vsinq.f32 %v511_v58  ;;  %v4004_v1 = vpop.eup %2942  ;;  %v422_v35 = vsel %vm4589_vm12, nan, %v421_v3  ;;  %v4638_v24 = vand.u32 2147483647, %v3345_v33  ;;  %v2820_v39 = vadd.s32 4294967294, %v1212_v45 }
 0x18e   :  { %2601 = vst.msk [vmem:[#allocation5 + $0x10] sm:$0xff] %vm2598_vm7, %v422_v35  ;;  %2627 = vrot.lane.b32.xlu0 %v422_v35, %s3062_s1  ;;  %vm311_vm8 = vcmp.lt.s32.totalorder %v310_v49, 2  ;;  %v316_v62 = vxor.u32 2147483648, %v4004_v1  ;;  %v1330_v55 = vmul.f32 %v1329_v12, %v1327_v14  ;;  %vm315_vm0 = vcmp.eq.s32.totalorder %v310_v49, 2  ;;  %v4644_v35 = vld [vmem:[#allocation16_spill] sm:$0xff] }
 0x18f   :  { %vm4011_vm4 = vcmp.le.f32.partialorder %v4638_v24, 0.7853982  ;;  %v4022_v16 = vpop.eup %2944  ;;  %v613_v9 = vsel %vm528_vm1, %v612_v10, %v4637_v26  ;;  %vm1249_vm15 = vcmp.lt.s32.totalorder %v3669_v38, 0  ;;  %vm2821_vm6 = vcmp.lt.s32.totalorder %v2820_v39, 0 }
 0x190   :  { %v614_v22 = vsel %vm4011_vm4, %v3345_v33, %v3877_v60  ;;  %vm312_vm3 = vcmp.eq.s32.totalorder %v310_v49, 0  ;;  %v313_v53 = vxor.u32 2147483648, %v4022_v16  ;;  %v317_v13 = vsel %vm315_vm0, %v316_v62, %v4022_v16 }
 0x191   :  { %2950 = vcosq.f32 %v614_v22  ;;  %v1215_v60 = vsel %vm2821_vm6, 0, %v2820_v39  ;;  %vm517_vm12 = vcmp.lt.s32.totalorder %v516_v50, 2  ;;  %v715_v28 = vsub.s32 4, %v4641_v17 }
 0x192   :  { %2952 = vsinq.f32 %v614_v22  ;;  %v1216_v15 = vsub.s32 32, %v1215_v60  ;;  %v1220_v51 = vsub.s32 4294967266, %v1215_v60  ;;  %v314_v4 = vsel %vm312_vm3, %v4004_v1, %v313_v53 }
 0x193   :  { %vm4610_vm1 = vweird.f32 %v3119_v30  ;;  %v4039_v21 = vsel %vm4011_vm4, 0, %v613_v9  ;;  %v1331_v58 = vxor.u32 2147483648, %v1330_v55  ;;  %v318_v56 = vsel %vm311_vm8, %v314_v4, %v317_v13 }
 0x194   :  { %vm518_vm0 = vcmp.eq.s32.totalorder %v516_v50, 0  ;;  %vm521_vm6 = vcmp.eq.s32.totalorder %v516_v50, 2  ;;  %v1221_v42 = vadd.s32 127, %v1220_v51  ;;  %v319_v14 = vsel %vm309_vm5, nan, %v318_v56 }
 0x195   :  { %v4643_v26 = vand.u32 2147483647, %v4642_v25  ;;  %v716_v10 = vsel %vm631_vm14, %v715_v28, %v4641_v17  ;;  %v1217_v3 = vshll.u32 %v3966_v37, %v1215_v60  ;;  %v1218_v49 = vshrl.u32 %v3962_v61, %v1216_v15  ;;  %2625 = vrot.lane.b32.xlu1 %v319_v14, %s3062_s1  ;;  %2600 = vst.msk [vmem:[#allocation5 + $0x8] sm:$0xff] %vm2598_vm7, %v319_v14  ;;  %v4648_v60 = vld [vmem:[#allocation15_spill] sm:$0xff] }
 0x196   :  { %v4049_v45 = vpop.eup %2946  ;;  %v619_v12 = vand.u32 3, %v4039_v21  ;;  %v1222_v39 = vshll.u32 %v1221_v42, 23  ;;  %v4645_v61 = vand.u32 2147483647, %v3419_v5  ;;  %v818_v17 = vsub.s32 4, %v4648_v60 }
 0x197   :  { %vm630_vm13 = vcmp.le.f32.partialorder %v4643_v26, 0.7853982  ;;  %v4058_v36 = vpop.eup %2948  ;;  %v4602_v22 = vxor.u32 2147483648, %v4049_v45  ;;  %v4084_v56 = vsel %vm1249_vm15, %v1331_v58, %v1330_v55  ;;  %v1219_v42 = vor.u32 %v1218_v49, %v1217_v3 }
 0x198   :  { %v717_v24 = vsel %vm630_vm13, %v4642_v25, %v4644_v35  ;;  %v4061_v9 = vsel %vm630_vm13, 0, %v716_v10  ;;  %v4603_v37 = vxor.u32 2147483648, %v4058_v36  ;;  %vm4066_vm14 = vcmp.le.f32.partialorder %v4645_v61, 0.7853982 }
 0x199   :  { %2954 = vcosq.f32 %v717_v24  ;;  %v1223_v28 = vor.u32 4788187, %v1222_v39  ;;  %v523_v15 = vsel %vm521_vm6, %v4602_v22, %v4058_v36  ;;  %vm4609_vm13 = vweird.f32 %v3345_v33 }
 0x19a   :  { %2956 = vsinq.f32 %v717_v24  ;;  %v820_v51 = vsel %vm4066_vm14, %v3419_v5, %v3900_v44  ;;  %v520_v14 = vsel %vm518_vm0, %v4049_v45, %v4603_v37  ;;  %vm620_vm4 = vcmp.lt.s32.totalorder %v619_v12, 2 }
 0x19b   :  { %v4080_v4 = vpop.eup %2950  ;;  %v524_v26 = vsel %vm517_vm12, %v520_v14, %v523_v15  ;;  %v722_v35 = vand.u32 3, %v4061_v9  ;;  %v819_v44 = vsel %vm734_vm9, %v818_v17, %v4648_v60  ;;  %v1224_v55 = vand.u32 2147483647, %v1223_v28  ;;  %v4652_v17 = vld [vmem:[#allocation14_spill] sm:$0xff] }
 0x19c   :  { %v4593_v10 = vxor.u32 2147483648, %v4080_v4  ;;  %v4096_v24 = vpop.eup %2952  ;;  %v525_v58 = vsel %vm4610_vm1, nan, %v524_v26  ;;  %vm624_vm8 = vcmp.eq.s32.totalorder %v619_v12, 2  ;;  %2958 = vcosq.f32 %v820_v51 }
 0x19d   :  { %2602 = vst.msk [vmem:[#allocation5 + $0x18] sm:$0xff] %vm2598_vm7, %v525_v58  ;;  %2629 = vrot.lane.b32.xlu1 %v525_v58, %s3062_s1  ;;  %v4597_v50 = vxor.u32 2147483648, %v4096_v24  ;;  %v4108_v49 = vsel %vm4066_vm14, 0, %v819_v44  ;;  %2960 = vsinq.f32 %v820_v51  ;;  %v1226_v39 = vcvt.s32.f32 %v1219_v42 }
 0x19e   :  { %v626_v3 = vsel %vm624_vm8, %v4593_v10, %v4096_v24  ;;  %vm621_vm9 = vcmp.eq.s32.totalorder %v619_v12, 0  ;;  %v4649_v61 = vand.u32 2147483647, %v3353_v40  ;;  %v921_v28 = vsub.s32 4, %v4652_v17 }
 0x19f   :  { %vm1146_vm3 = vcmp.lt.s32.totalorder %v3672_v6, 0  ;;  %v623_v15 = vsel %vm621_vm9, %v4080_v4, %v4597_v50  ;;  %vm4607_vm0 = vweird.f32 %v4642_v25  ;;  %vm723_vm6 = vcmp.lt.s32.totalorder %v722_v35, 2 }
 0x1a0   :  { %vm4112_vm12 = vcmp.le.f32.partialorder %v4649_v61, 0.7853982  ;;  %v1227_v51 = vmul.f32 %v1226_v39, %v1224_v55  ;;  %v627_v42 = vsel %vm620_vm4, %v623_v15, %v626_v3  ;;  %vm724_vm14 = vcmp.eq.s32.totalorder %v722_v35, 0 }
 0x1a1   :  { %v923_v13 = vsel %vm4112_vm12, %v3353_v40, %v3888_v0  ;;  %v825_v14 = vand.u32 3, %v4108_v49  ;;  %v628_v44 = vsel %vm4609_vm13, nan, %v627_v42  ;;  %v922_v58 = vsel %vm837_vm2, %v921_v28, %v4652_v17 }
 0x1a2   :  { %2962 = vcosq.f32 %v923_v13  ;;  %v4653_v61 = vand.u32 2147483647, %v3601_v29  ;;  %2631 = vrot.lane.b32.xlu0 %v628_v44, %s3062_s1  ;;  %2603 = vst.msk [vmem:[#allocation5 + $0x20] sm:$0xff] %vm2598_vm7, %v628_v44  ;;  %v4148_v3 = vsel %vm4112_vm12, 0, %v922_v58  ;;  %v1024_v39 = vsub.s32 4, %v3752_v43 }
 0x1a3   :  { %v4128_v26 = vpop.eup %2954  ;;  %2964 = vsinq.f32 %v923_v13  ;;  %vm727_vm2 = vcmp.eq.s32.totalorder %v722_v35, 2  ;;  %vm4595_vm4 = vweird.f32 %v3419_v5  ;;  %v1228_v15 = vxor.u32 2147483648, %v1227_v51 }
 0x1a4   :  { %vm4137_vm8 = vcmp.le.f32.partialorder %v4653_v61, 0.7853982  ;;  %v4141_v12 = vpop.eup %2956  ;;  %v4591_v55 = vxor.u32 2147483648, %v4128_v26  ;;  %v1025_v13 = vsel %vm940_vm11, %v1024_v39, %v3752_v43  ;;  %vm826_vm9 = vcmp.lt.s32.totalorder %v825_v14, 2 }
 0x1a5   :  { %v4592_v17 = vxor.u32 2147483648, %v4141_v12  ;;  %v1026_v28 = vsel %vm4137_vm8, %v3601_v29, %v3926_v63  ;;  %v928_v44 = vand.u32 3, %v4148_v3  ;;  %v4656_v63 = vand.u32 2147483647, %v3518_v52 }
 0x1a6   :  { %v729_v60 = vsel %vm727_vm2, %v4591_v55, %v4141_v12  ;;  %2966 = vcosq.f32 %v1026_v28  ;;  %v4174_v61 = vpop.eup %2958  ;;  %v4179_v43 = vsel %vm4137_vm8, 0, %v1025_v13  ;;  %v1127_v39 = vsub.s32 4, %v3694_v34 }
 0x1a7   :  { %v726_v42 = vsel %vm724_vm14, %v4128_v26, %v4592_v17  ;;  %vm4170_vm12 = vcmp.le.f32.partialorder %v4656_v63, 0.7853982  ;;  %2968 = vsinq.f32 %v1026_v28  ;;  %v4182_v17 = vpop.eup %2960  ;;  %vm830_vm11 = vcmp.eq.s32.totalorder %v825_v14, 2 }
 0x1a8   :  { %v730_v55 = vsel %vm723_vm6, %v726_v42, %v729_v60  ;;  %v4594_v63 = vxor.u32 2147483648, %v4174_v61  ;;  %v1129_v35 = vsel %vm4170_vm12, %v3518_v52, %v3917_v47  ;;  %v1229_v0 = vsel %vm1146_vm3, %v1228_v15, %v1227_v51 }
 0x1a9   :  { %v731_v10 = vsel %vm4607_vm0, nan, %v730_v55  ;;  %v4596_v28 = vxor.u32 2147483648, %v4182_v17  ;;  %vm4606_vm6 = vweird.f32 %v3353_v40  ;;  %v1128_v55 = vsel %vm1043_vm10, %v1127_v39, %v3694_v34 }
 0x1aa   :  { %2604 = vst.msk [vmem:[#allocation5 + $0x28] sm:$0xff] %vm2598_vm7, %v731_v10  ;;  %2633 = vrot.lane.b32.xlu1 %v731_v10, %s3062_s1  ;;  %2970 = vcosq.f32 %v1129_v35  ;;  %vm827_vm14 = vcmp.eq.s32.totalorder %v825_v14, 0  ;;  %v832_v47 = vsel %vm830_vm11, %v4594_v63, %v4182_v17  ;;  %vm929_vm8 = vcmp.lt.s32.totalorder %v928_v44, 2 }
 0x1ab   :  { %v1031_v51 = vand.u32 3, %v4179_v43  ;;  %v829_v10 = vsel %vm827_vm14, %v4174_v61, %v4596_v28  ;;  %v4209_v15 = vsel %vm4170_vm12, 0, %v1128_v55  ;;  %2972 = vsinq.f32 %v1129_v35 }
 0x1ac   :  { %v4659_v34 = vand.u32 2147483647, %v3672_v6  ;;  %v4217_v13 = vpop.eup %2962  ;;  %v833_v42 = vsel %vm826_vm9, %v829_v10, %v832_v47  ;;  %vm930_vm2 = vcmp.eq.s32.totalorder %v928_v44, 0  ;;  %v1230_v39 = vsub.s32 4, %v3950_v18 }
 0x1ad   :  { %v4224_v55 = vpop.eup %2964  ;;  %v834_v35 = vsel %vm4595_vm4, nan, %v833_v42  ;;  %vm933_vm12 = vcmp.eq.s32.totalorder %v928_v44, 2  ;;  %vm4605_vm11 = vweird.f32 %v3601_v29  ;;  %vm1032_vm9 = vcmp.lt.s32.totalorder %v1031_v51, 2 }
 0x1ae   :  { %vm4213_vm10 = vcmp.le.f32.partialorder %v4659_v34, 0.7853982  ;;  %v4598_v34 = vxor.u32 2147483648, %v4217_v13  ;;  %2635 = vrot.lane.b32.xlu0 %v834_v35, %s3062_s1  ;;  %2605 = vst.msk [vmem:[#allocation5 + $0x30] sm:$0xff] %vm2598_vm7, %v834_v35  ;;  %v4599_v14 = vxor.u32 2147483648, %v4224_v55  ;;  %vm1033_vm14 = vcmp.eq.s32.totalorder %v1031_v51, 0 }
 0x1af   :  { %v1232_v58 = vsel %vm4213_vm10, %v3672_v6, %v1229_v0  ;;  %v1134_v0 = vand.u32 3, %v4209_v15  ;;  %v1231_v42 = vsel %vm1146_vm3, %v1230_v39, %v3950_v18  ;;  %v4662_v63 = vand.u32 2147483647, %v3669_v38 }
 0x1b0   :  { %2974 = vcosq.f32 %v1232_v58  ;;  %v4234_v47 = vpop.eup %2966  ;;  %v935_v10 = vsel %vm933_vm12, %v4598_v34, %v4224_v55  ;;  %v932_v28 = vsel %vm930_vm2, %v4217_v13, %v4599_v14  ;;  %v4255_v34 = vsel %vm4213_vm10, 0, %v1231_v42 }
 0x1b1   :  { %2976 = vsinq.f32 %v1232_v58  ;;  %vm4244_vm4 = vcmp.le.f32.partialorder %v4662_v63, 0.7853982  ;;  %v4600_v50 = vxor.u32 2147483648, %v4234_v47  ;;  %v1333_v18 = vsub.s32 4, %v3828_v7  ;;  %v4258_v39 = vpop.eup %2968 }
 0x1b2   :  { %v936_v63 = vsel %vm929_vm8, %v932_v28, %v935_v10  ;;  %vm1036_vm3 = vcmp.eq.s32.totalorder %v1031_v51, 2  ;;  %vm4608_vm12 = vweird.f32 %v3518_v52  ;;  %v4263_v58 = vand.u32 3, %v4255_v34 }
 0x1b3   :  { %v1335_v14 = vsel %vm4244_vm4, %v3669_v38, %v4084_v56  ;;  %v937_v60 = vsel %vm4606_vm6, nan, %v936_v63  ;;  %v4601_v42 = vxor.u32 2147483648, %v4258_v39  ;;  %v1038_v44 = vsel %vm1036_vm3, %v4600_v50, %v4258_v39 }
 0x1b4   :  { %v1334_v28 = vsel %vm1249_vm15, %v1333_v18, %v3828_v7  ;;  %v4278_v10 = vpop.eup %2970  ;;  %2606 = vst.msk [vmem:[#allocation5 + $0x38] sm:$0xff] %vm2598_vm7, %v937_v60  ;;  %2637 = vrot.lane.b32.xlu1 %v937_v60, %s3062_s1  ;;  %vm1135_vm8 = vcmp.lt.s32.totalorder %v1134_v0, 2  ;;  %vm1136_vm10 = vcmp.eq.s32.totalorder %v1134_v0, 0  ;;  %vm1139_vm2 = vcmp.eq.s32.totalorder %v1134_v0, 2 }
 0x1b5   :  { %v4284_v56 = vsel %vm4244_vm4, 0, %v1334_v28  ;;  %v1035_v63 = vsel %vm1033_vm14, %v4234_v47, %v4601_v42  ;;  %v4604_v7 = vxor.u32 2147483648, %v4278_v10  ;;  %2978 = vcosq.f32 %v1335_v14  ;;  %v4294_v50 = vpop.eup %2972 }
 0x1b6   :  { %v4292_v18 = vand.u32 3, %v4284_v56  ;;  %v1039_v60 = vsel %vm1032_vm9, %v1035_v63, %v1038_v44  ;;  %vm1236_vm15 = vweird.f32 %v3672_v6  ;;  %2980 = vsinq.f32 %v1335_v14 }
 0x1b7   :  { %v1443_v35 = vadd.s32 3, %v3870_v57  ;;  %v1547_v28 = vadd.s32 3, %v3975_v23  ;;  %v1040_v42 = vsel %vm4605_vm11, nan, %v1039_v60  ;;  %v1137_v22 = vxor.u32 2147483648, %v4294_v50 }
 0x1b8   :  { %v1141_v37 = vsel %vm1139_vm2, %v4604_v7, %v4294_v50  ;;  %vm1238_vm4 = vcmp.lt.s32.totalorder %v4263_v58, 2  ;;  %2639 = vrot.lane.b32.xlu0 %v1040_v42, %s3062_s1  ;;  %2607 = vst.msk [vmem:[#allocation5 + $0x40] sm:$0xff] %vm2598_vm7, %v1040_v42  ;;  %vm1239_vm9 = vcmp.eq.s32.totalorder %v4263_v58, 0  ;;  %vm1242_vm14 = vcmp.eq.s32.totalorder %v4263_v58, 2 }
 0x1b9   :  { %v1444_v57 = vand.u32 3, %v1443_v35  ;;  %v1548_v23 = vand.u32 3, %v1547_v28  ;;  %v1138_v14 = vsel %vm1136_vm10, %v4278_v10, %v1137_v22  ;;  %vm1345_vm3 = vcmp.eq.s32.totalorder %v4292_v18, 2 }
 0x1ba   :  { %v4307_v51 = vpop.eup %2974  ;;  %v1651_v63 = vadd.s32 3, %v3931_v48  ;;  %v1755_v60 = vadd.s32 3, %v3995_v8  ;;  %v1142_v7 = vsel %vm1135_vm8, %v1138_v14, %v1141_v37  ;;  %vm1342_vm2 = vcmp.eq.s32.totalorder %v4292_v18, 0 }
 0x1bb   :  { %v1243_v44 = vxor.u32 2147483648, %v4307_v51  ;;  %v4321_v42 = vpop.eup %2976  ;;  %vm1445_vm11 = vcmp.lt.s32.totalorder %v1444_v57, 2  ;;  %vm1446_vm6 = vcmp.eq.s32.totalorder %v1444_v57, 0  ;;  %vm1449_vm0 = vcmp.eq.s32.totalorder %v1444_v57, 2 }
 0x1bc   :  { %v1143_v35 = vsel %vm4608_vm12, nan, %v1142_v7  ;;  %v1240_v28 = vxor.u32 2147483648, %v4321_v42  ;;  %vm1341_vm10 = vcmp.lt.s32.totalorder %v4292_v18, 2  ;;  %v1448_v8 = vsel %vm1446_vm6, %v3922_v59, %v210_v27 }
 0x1bd   :  { %v1244_v48 = vsel %vm1242_vm14, %v1243_v44, %v4321_v42  ;;  %2608 = vst.msk [vmem:[#allocation5 + $0x48] sm:$0xff] %vm2598_vm7, %v1143_v35  ;;  %2641 = vrot.lane.b32.xlu1 %v1143_v35, %s3062_s1  ;;  %vm1339_vm8 = vweird.f32 %v3669_v38  ;;  %v1451_v37 = vsel %vm1449_vm0, %v213_v31, %v3939_v46  ;;  %vm1549_vm12 = vcmp.lt.s32.totalorder %v1548_v23, 2 }
 0x1be   :  { %vm1550_vm13 = vcmp.eq.s32.totalorder %v1548_v23, 0  ;;  %vm1553_vm1 = vcmp.eq.s32.totalorder %v1548_v23, 2  ;;  %v1241_v0 = vsel %vm1239_vm9, %v4307_v51, %v1240_v28  ;;  %v1452_v27 = vsel %vm1445_vm11, %v1448_v8, %v1451_v37 }
 0x1bf   :  { %v1552_v7 = vsel %vm1550_vm13, %v4004_v1, %v313_v53  ;;  %v1555_v59 = vsel %vm1553_vm1, %v316_v62, %v4022_v16  ;;  %v1245_v31 = vsel %vm1238_vm4, %v1241_v0, %v1244_v48  ;;  %vm4665_vm0 = vweird.f32 %v3108_v20  ;;  %v4359_v35 = vpop.eup %2978 }
 0x1c0   :  { %v1453_v46 = vsel %vm4665_vm0, nan, %v1452_v27  ;;  %v1556_v23 = vsel %vm1549_vm12, %v1552_v7, %v1555_v59  ;;  %v1652_v14 = vand.u32 3, %v1651_v63  ;;  %v1246_v57 = vsel %vm1236_vm15, nan, %v1245_v31  ;;  %v4367_v16 = vpop.eup %2980 }
 0x1c1   :  { %2672 = vst.msk [vmem:[#allocation6] sm:$0xff] %vm2598_vm7, %v1453_v46  ;;  %v1557_v53 = vsel %vm309_vm5, nan, %v1556_v23  ;;  %v1756_v1 = vand.u32 3, %v1755_v60  ;;  %v1859_v62 = vadd.s32 3, %v4039_v21  ;;  %2643 = vrot.lane.b32.xlu0 %v1246_v57, %s3062_s1  ;;  %2609 = vst.msk [vmem:[#allocation5 + $0x50] sm:$0xff] %vm2598_vm7, %v1246_v57  ;;  %v1346_v20 = vxor.u32 2147483648, %v4359_v35 }
 0x1c2   :  { %2673 = vst.msk [vmem:[#allocation6 + $0x8] sm:$0xff] %vm2598_vm7, %v1557_v53  ;;  %vm1653_vm1 = vcmp.lt.s32.totalorder %v1652_v14, 2  ;;  %vm1654_vm13 = vcmp.eq.s32.totalorder %v1652_v14, 0  ;;  %vm1657_vm6 = vcmp.eq.s32.totalorder %v1652_v14, 2  ;;  %v1343_v58 = vxor.u32 2147483648, %v4367_v16 }
 0x1c3   :  { %v1656_v32 = vsel %vm1654_vm13, %v3970_v41, %v416_v11  ;;  %v1659_v21 = vsel %vm1657_vm6, %v419_v54, %v3978_v2  ;;  %vm1757_vm5 = vcmp.lt.s32.totalorder %v1756_v1, 2  ;;  %v1347_v63 = vsel %vm1345_vm3, %v1346_v20, %v4367_v16 }
 0x1c4   :  { %v1660_v60 = vsel %vm1653_vm1, %v1656_v32, %v1659_v21  ;;  %vm1758_vm11 = vcmp.eq.s32.totalorder %v1756_v1, 0  ;;  %vm1761_vm12 = vcmp.eq.s32.totalorder %v1756_v1, 2  ;;  %v1344_v11 = vsel %vm1342_vm2, %v4359_v35, %v1343_v58 }
 0x1c5   :  { %vm4666_vm4 = vweird.f32 %v3105_v19  ;;  %v4667_v2 = vxor.u32 2147483648, %v4058_v36  ;;  %v4668_v48 = vxor.u32 2147483648, %v4049_v45  ;;  %v1348_v37 = vsel %vm1341_vm10, %v1344_v11, %v1347_v63  ;;  %2696 = vrot.lane.b32.xlu0 %v1453_v46, %s3062_s1 }
 0x1c6   :  { %v1661_v41 = vsel %vm4666_vm4, nan, %v1660_v60  ;;  %v1860_v27 = vand.u32 3, %v1859_v62  ;;  %v1963_v19 = vadd.s32 3, %v4061_v9  ;;  %v1349_v7 = vsel %vm1339_vm8, nan, %v1348_v37 }
 0x1c7   :  { %v1760_v54 = vsel %vm1758_vm11, %v4049_v45, %v4667_v2  ;;  %v1763_v8 = vsel %vm1761_vm12, %v4668_v48, %v4058_v36  ;;  %2674 = vst.msk [vmem:[#allocation6 + $0x10] sm:$0xff] %vm2598_vm7, %v1661_v41  ;;  %vm4669_vm9 = vweird.f32 %v3119_v30  ;;  %v2067_v45 = vadd.s32 3, %v4108_v49  ;;  %2610 = vst.msk [vmem:[#allocation5 + $0x58] sm:$0xff] %vm2598_vm7, %v1349_v7  ;;  %2645 = vrot.lane.b32.xlu1 %v1349_v7, %s3062_s1 }
 0x1c8   :  { %v1764_v0 = vsel %vm1757_vm5, %v1760_v54, %v1763_v8  ;;  %v2171_v36 = vadd.s32 3, %v4148_v3  ;;  %vm1861_vm14 = vcmp.lt.s32.totalorder %v1860_v27, 2  ;;  %vm1862_vm3 = vcmp.eq.s32.totalorder %v1860_v27, 0 }
 0x1c9   :  { %v1765_v59 = vsel %vm4669_vm9, nan, %v1764_v0  ;;  %vm1865_vm2 = vcmp.eq.s32.totalorder %v1860_v27, 2  ;;  %v1964_v9 = vand.u32 3, %v1963_v19  ;;  %v4670_v18 = vxor.u32 2147483648, %v4096_v24  ;;  %2700 = vrot.lane.b32.xlu0 %v1661_v41, %s3062_s1 }
 0x1ca   :  { %2675 = vst.msk [vmem:[#allocation6 + $0x18] sm:$0xff] %vm2598_vm7, %v1765_v59  ;;  %v4671_v30 = vxor.u32 2147483648, %v4080_v4  ;;  %v2068_v46 = vand.u32 3, %v2067_v45  ;;  %v2172_v3 = vand.u32 3, %v2171_v36  ;;  %vm4672_vm13 = vweird.f32 %v3345_v33 }
 0x1cb   :  { %v1864_v31 = vsel %vm1862_vm3, %v4080_v4, %v4670_v18  ;;  %vm1965_vm10 = vcmp.lt.s32.totalorder %v1964_v9, 2  ;;  %vm1966_vm0 = vcmp.eq.s32.totalorder %v1964_v9, 0  ;;  %vm1969_vm1 = vcmp.eq.s32.totalorder %v1964_v9, 2  ;;  %2698 = vrot.lane.b32.xlu1 %v1557_v53, %s3062_s1 }
 0x1cc   :  { %v1867_v49 = vsel %vm1865_vm2, %v4671_v30, %v4096_v24  ;;  %v4673_v57 = vxor.u32 2147483648, %v4141_v12  ;;  %v4674_v62 = vxor.u32 2147483648, %v4128_v26  ;;  %vm2069_vm6 = vcmp.lt.s32.totalorder %v2068_v46, 2 }
 0x1cd   :  { %v1868_v23 = vsel %vm1861_vm14, %v1864_v31, %v1867_v49  ;;  %vm2070_vm5 = vcmp.eq.s32.totalorder %v2068_v46, 0  ;;  %vm2073_vm11 = vcmp.eq.s32.totalorder %v2068_v46, 2  ;;  %vm2173_vm12 = vcmp.lt.s32.totalorder %v2172_v3, 2 }
 0x1ce   :  { %v1869_v14 = vsel %vm4672_vm13, nan, %v1868_v23  ;;  %v1968_v1 = vsel %vm1966_vm0, %v4128_v26, %v4673_v57  ;;  %v1971_v4 = vsel %vm1969_vm1, %v4674_v62, %v4141_v12  ;;  %vm4675_vm4 = vweird.f32 %v4642_v25 }
 0x1cf   :  { %2676 = vst.msk [vmem:[#allocation6 + $0x20] sm:$0xff] %vm2598_vm7, %v1869_v14  ;;  %v1972_v24 = vsel %vm1965_vm10, %v1968_v1, %v1971_v4  ;;  %v4676_v32 = vxor.u32 2147483648, %v4182_v17  ;;  %v4677_v26 = vxor.u32 2147483648, %v4174_v61  ;;  %vm2174_vm9 = vcmp.eq.s32.totalorder %v2172_v3, 0  ;;  %2704 = vrot.lane.b32.xlu0 %v1869_v14, %s3062_s1  ;;  %2702 = vrot.lane.b32.xlu1 %v1765_v59, %s3062_s1 }
 0x1d0   :  { %v1973_v33 = vsel %vm4675_vm4, nan, %v1972_v24  ;;  %v4678_v63 = vxor.u32 2147483648, %v4224_v55  ;;  %vm2177_vm14 = vcmp.eq.s32.totalorder %v2172_v3, 2  ;;  %v2275_v25 = vadd.s32 3, %v4179_v43 }
 0x1d1   :  { %v2072_v21 = vsel %vm2070_vm5, %v4174_v61, %v4676_v32  ;;  %v2075_v12 = vsel %vm2073_vm11, %v4677_v26, %v4182_v17  ;;  %2677 = vst.msk [vmem:[#allocation6 + $0x28] sm:$0xff] %vm2598_vm7, %v1973_v33  ;;  %vm4679_vm3 = vweird.f32 %v3419_v5  ;;  %v4680_v61 = vxor.u32 2147483648, %v4217_v13 }
 0x1d2   :  { %v2076_v53 = vsel %vm2069_vm6, %v2072_v21, %v2075_v12  ;;  %v2176_v60 = vsel %vm2174_vm9, %v4217_v13, %v4678_v63  ;;  %v2379_v41 = vadd.s32 3, %v4209_v15  ;;  %v2483_v2 = vadd.s32 3, %v4255_v34 }
 0x1d3   :  { %v2077_v11 = vsel %vm4679_vm3, nan, %v2076_v53  ;;  %v2179_v17 = vsel %vm2177_vm14, %v4680_v61, %v4224_v55  ;;  %v2276_v48 = vand.u32 3, %v2275_v25  ;;  %v2587_v43 = vadd.s32 3, %v4284_v56  ;;  %2706 = vrot.lane.b32.xlu1 %v1973_v33, %s3062_s1 }
 0x1d4   :  { %2678 = vst.msk [vmem:[#allocation6 + $0x30] sm:$0xff] %vm2598_vm7, %v2077_v11  ;;  %v2180_v54 = vsel %vm2173_vm12, %v2176_v60, %v2179_v17  ;;  %vm4681_vm2 = vweird.f32 %v3353_v40  ;;  %v2380_v8 = vand.u32 3, %v2379_v41  ;;  %v2484_v37 = vand.u32 3, %v2483_v2  ;;  %2708 = vrot.lane.b32.xlu0 %v2077_v11, %s3062_s1 }
 0x1d5   :  { %v2181_v5 = vsel %vm4681_vm2, nan, %v2180_v54  ;;  %vm2277_vm10 = vcmp.lt.s32.totalorder %v2276_v48, 2  ;;  %vm2278_vm0 = vcmp.eq.s32.totalorder %v2276_v48, 0  ;;  %vm2281_vm1 = vcmp.eq.s32.totalorder %v2276_v48, 2 }
 0x1d6   :  { %2679 = vst.msk [vmem:[#allocation6 + $0x38] sm:$0xff] %vm2598_vm7, %v2181_v5  ;;  %v4682_v15 = vxor.u32 2147483648, %v4258_v39  ;;  %v4683_v55 = vxor.u32 2147483648, %v4234_v47  ;;  %vm2382_vm13 = vcmp.eq.s32.totalorder %v2380_v8, 0  ;;  %v2588_v40 = vand.u32 3, %v2587_v43 }
 0x1d7   :  { %vm2381_vm6 = vcmp.lt.s32.totalorder %v2380_v8, 2  ;;  %v2384_v0 = vsel %vm2382_vm13, %v4278_v10, %v1137_v22  ;;  %vm2385_vm5 = vcmp.eq.s32.totalorder %v2380_v8, 2  ;;  %vm4684_vm11 = vweird.f32 %v3601_v29  ;;  %2710 = vrot.lane.b32.xlu1 %v2181_v5, %s3062_s1 }
 0x1d8   :  { %v2280_v13 = vsel %vm2278_vm0, %v4234_v47, %v4682_v15  ;;  %v2283_v34 = vsel %vm2281_vm1, %v4683_v55, %v4258_v39  ;;  %v4685_v19 = vxor.u32 2147483648, %v4278_v10  ;;  %vm2486_vm12 = vcmp.eq.s32.totalorder %v2484_v37, 0 }
 0x1d9   :  { %v2284_v56 = vsel %vm2277_vm10, %v2280_v13, %v2283_v34  ;;  %vm2489_vm4 = vcmp.eq.s32.totalorder %v2484_v37, 2  ;;  %vm2485_vm9 = vcmp.lt.s32.totalorder %v2484_v37, 2  ;;  %v2488_v22 = vsel %vm2486_vm12, %v4307_v51, %v1240_v28 }
 0x1da   :  { %v2285_v27 = vsel %vm4684_vm11, nan, %v2284_v56  ;;  %v2387_v7 = vsel %vm2385_vm5, %v4685_v19, %v4294_v50  ;;  %v2491_v29 = vsel %vm2489_vm4, %v1243_v44, %v4321_v42  ;;  %vm4686_vm14 = vweird.f32 %v3518_v52 }
 0x1db   :  { %2680 = vst.msk [vmem:[#allocation6 + $0x40] sm:$0xff] %vm2598_vm7, %v2285_v27  ;;  %2712 = vrot.lane.b32.xlu0 %v2285_v27, %s3062_s1  ;;  %v2388_v47 = vsel %vm2381_vm6, %v2384_v0, %v2387_v7  ;;  %v2492_v50 = vsel %vm2485_vm9, %v2488_v22, %v2491_v29  ;;  %vm2590_vm3 = vcmp.eq.s32.totalorder %v2588_v40, 0  ;;  %vm2593_vm2 = vcmp.eq.s32.totalorder %v2588_v40, 2 }
 0x1dc   :  { %v2389_v39 = vsel %vm4686_vm14, nan, %v2388_v47  ;;  %v2493_v10 = vsel %vm1236_vm15, nan, %v2492_v50  ;;  %vm2589_vm10 = vcmp.lt.s32.totalorder %v2588_v40, 2  ;;  %v2592_v28 = vsel %vm2590_vm3, %v4359_v35, %v1343_v58 }
 0x1dd   :  { %2681 = vst.msk [vmem:[#allocation6 + $0x48] sm:$0xff] %vm2598_vm7, %v2389_v39  ;;  %v2595_v52 = vsel %vm2593_vm2, %v1346_v20, %v4367_v16  ;;  %2682 = vst.msk [vmem:[#allocation6 + $0x50] sm:$0xff] %vm2598_vm7, %v2493_v10  ;;  %2714 = vrot.lane.b32.xlu1 %v2389_v39, %s3062_s1  ;;  %vm2659_vm15 = vcmask 1048064  }
 0x1de   :  { %v2596_v51 = vsel %vm2589_vm10, %v2592_v28, %v2595_v52 }
 0x1df   :  { %2716 = vrot.lane.b32.xlu0 %v2493_v10, %s3062_s1  ;;  %v2597_v44 = vsel %vm1339_vm8, nan, %v2596_v51 }
 0x1e0   :  { %2683 = vst.msk [vmem:[#allocation6 + $0x58] sm:$0xff] %vm2598_vm7, %v2597_v44 }
 0x1e1   :  { %2718 = vrot.lane.b32.xlu1 %v2597_v44, %s3062_s1 }
 0x1f8   :  { %v2624_v6 = vpop.permute.xlu0 %2623 }
 0x1f9   :  { %2660 = vst.msk [vmem:[#allocation5] sm:$0xff] %vm2659_vm15, %v2624_v6 }
 0x200   :  { %v2628_v42 = vpop.permute.xlu0 %2627 }
 0x201   :  { %2662 = vst.msk [vmem:[#allocation5 + $0x10] sm:$0xff] %vm2659_vm15, %v2628_v42 }
 0x207   :  { %v2626_v35 = vpop.permute.xlu1 %2625 }
 0x208   :  { %2661 = vst.msk [vmem:[#allocation5 + $0x8] sm:$0xff] %vm2659_vm15, %v2626_v35 }
 0x20f   :  { %v2630_v16 = vpop.permute.xlu1 %2629 }
 0x210   :  { %2663 = vst.msk [vmem:[#allocation5 + $0x18] sm:$0xff] %vm2659_vm15, %v2630_v16 }
 0x214   :  { %v2632_v38 = vpop.permute.xlu0 %2631 }
 0x215   :  { %2664 = vst.msk [vmem:[#allocation5 + $0x20] sm:$0xff] %vm2659_vm15, %v2632_v38 }
 0x21c   :  { %v2634_v20 = vpop.permute.xlu1 %2633 }
 0x21d   :  { %2665 = vst.msk [vmem:[#allocation5 + $0x28] sm:$0xff] %vm2659_vm15, %v2634_v20 }
 0x220   :  { %v2636_v58 = vpop.permute.xlu0 %2635 }
 0x221   :  { %2666 = vst.msk [vmem:[#allocation5 + $0x30] sm:$0xff] %vm2659_vm15, %v2636_v58 }
 0x226   :  { %v2638_v59 = vpop.permute.xlu1 %2637 }
 0x227   :  { %2667 = vst.msk [vmem:[#allocation5 + $0x38] sm:$0xff] %vm2659_vm15, %v2638_v59 }
 0x22a   :  { %v2640_v45 = vpop.permute.xlu0 %2639 }
 0x22b   :  { %2668 = vst.msk [vmem:[#allocation5 + $0x40] sm:$0xff] %vm2659_vm15, %v2640_v45 }
 0x22f   :  { %v2642_v36 = vpop.permute.xlu1 %2641 }
 0x230   :  { %2669 = vst.msk [vmem:[#allocation5 + $0x48] sm:$0xff] %vm2659_vm15, %v2642_v36 }
 0x233   :  { %v2644_v9 = vpop.permute.xlu0 %2643 }
 0x234   :  { %2670 = vst.msk [vmem:[#allocation5 + $0x50] sm:$0xff] %vm2659_vm15, %v2644_v9 }
 0x237   :  { %v2697_v18 = vpop.permute.xlu0 %2696 }
 0x238   :  { %2732 = vst.msk [vmem:[#allocation6] sm:$0xff] %vm2659_vm15, %v2697_v18 }
 0x239   :  { %v2646_v31 = vpop.permute.xlu1 %2645 }
 0x23a   :  { %2671 = vst.msk [vmem:[#allocation5 + $0x58] sm:$0xff] %vm2659_vm15, %v2646_v31 }
 0x23b   :  { %v2701_v30 = vpop.permute.xlu0 %2700 }
 0x23c   :  { %3016 = shalt.err (!%p3013_p12)
}
 0x23d   :  { %s3017_s5 = scalar_lea.hbm %s4556_s2, 1536 }
 0x23e   :  { %p3018_p13 = scmp.ne.s32.totalorder %s4556_s2, %s3017_s5  ;;  %p3021_p0 = scmp.lt.u32.totalorder %s3017_s5, %s4556_s2 }
 0x240   :  { %p3023_p1 = pnand %p3021_p0, %p3018_p13 }
 0x242   :  { %3026 = shalt.err (!%p3023_p1)
}
 0x243   :  { %s3064_s10 = smov 128   ;;  %s3065_s11 = smov 8   ;;  %2734 = vst.msk [vmem:[#allocation6 + $0x10] sm:$0xff] %vm2659_vm15, %v2701_v30  ;;  %v2699_v49 = vpop.permute.xlu1 %2698  ;;  %v2705_v46 = vpop.permute.xlu0 %2704 }
 0x244   :  { %2755 = dma.vmem_to_hbm [thread:$0]  %s2750_s28, 1536, %s4556_s2, [#allocation4], %s3064_s10, %s3064_s10, %s3065_s11   ;;  %2733 = vst.msk [vmem:[#allocation6 + $0x8] sm:$0xff] %vm2659_vm15, %v2699_v49  ;;  %2736 = vst.msk [vmem:[#allocation6 + $0x20] sm:$0xff] %vm2659_vm15, %v2705_v46 }
 0x245   :  { %s3066_s2 = smov [#allocation6]  }
 0x246   :  { %s2761_s14 = sshll.u32 %s3066_s2, 4  ;;  %s2762_s14 = int_to_ptr.vmem [resolvable:$true] %s2761_s14 }
 0x247   :  { %v2703_v3 = vpop.permute.xlu1 %2702  ;;  %v2709_v23 = vpop.permute.xlu0 %2708  ;;  %s3027_s15 = scalar_lea.vmem %s2762_s14, 1536  ;;  %p3032_p3 = scmp.lt.s32.totalorder %s2762_s14, %s2762_s14 }
 0x248   :  { %2735 = vst.msk [vmem:[#allocation6 + $0x18] sm:$0xff] %vm2659_vm15, %v2703_v3  ;;  %2738 = vst.msk [vmem:[#allocation6 + $0x30] sm:$0xff] %vm2659_vm15, %v2709_v23  ;;  %p3028_p2 = scmp.ne.s32.totalorder %s2762_s14, %s3027_s15  ;;  %p3033_p4 = scmp.lt.s32.totalorder %s3027_s15, %s3027_s15 }
 0x24a   :  { %p3034_p5 = por %p3033_p4, %p3032_p3 }
 0x24b   :  { %v2707_v14 = vpop.permute.xlu1 %2706 }
 0x24c   :  { %2737 = vst.msk [vmem:[#allocation6 + $0x28] sm:$0xff] %vm2659_vm15, %v2707_v14  ;;  %p3035_p6 = pnand %p3034_p5, %p3028_p2 }
 0x24d   :  { %v2713_v57 = vpop.permute.xlu0 %2712 }
 0x24e   :  { %2740 = vst.msk [vmem:[#allocation6 + $0x40] sm:$0xff] %vm2659_vm15, %v2713_v57 }
 0x24f   :  { %v2711_v1 = vpop.permute.xlu1 %2710 }
 0x250   :  { %2739 = vst.msk [vmem:[#allocation6 + $0x38] sm:$0xff] %vm2659_vm15, %v2711_v1 }
 0x251   :  { %v2717_v62 = vpop.permute.xlu0 %2716 }
 0x252   :  { %2742 = vst.msk [vmem:[#allocation6 + $0x50] sm:$0xff] %vm2659_vm15, %v2717_v62 }
 0x253   :  { %v2715_v4 = vpop.permute.xlu1 %2714 }
 0x254   :  { %2741 = vst.msk [vmem:[#allocation6 + $0x48] sm:$0xff] %vm2659_vm15, %v2715_v4 }
 0x257   :  { %v2719_v24 = vpop.permute.xlu1 %2718 }
 0x258   :  { %2743 = vst.msk [vmem:[#allocation6 + $0x58] sm:$0xff] %vm2659_vm15, %v2719_v24 }
 0x259   :  { %3038 = shalt.err (!%p3035_p6)
}
 0x25a   :  { %s3039_s18 = scalar_lea.hbm %s4557_s3, 1536 }
 0x25b   :  { %p3040_p7 = scmp.ne.s32.totalorder %s4557_s3, %s3039_s18  ;;  %p3043_p8 = scmp.lt.u32.totalorder %s3039_s18, %s4557_s3 }
 0x25d   :  { %p3045_p9 = pnand %p3043_p8, %p3040_p7 }
 0x25f   :  { %3048 = shalt.err (!%p3045_p9)
}
 0x260   :  { %2767 = dma.vmem_to_hbm [thread:$0]  %s2762_s14, 1536, %s4557_s3, [#allocation7], %s3064_s10, %s3064_s10, %s3065_s11  }
 0x261   :  { %3051 = dma.done.wait [#allocation4], 1536  }
 0x262   :  { %3052 = vsyncadd [#allocation4], 4294965760 }
 0x263   :  { %3053 = dma.done.wait [#allocation7], 1536  }
 0x264   :  { %3054 = vsyncadd [#allocation7], 4294965760 }
 0x265   :  { %2774 = vsyncpa [#allocation3], 1 }
 0x266   :  { %2775 = vsyncpa [#allocation4], 1 }
 0x267   :  { %2776 = vsyncpa [#allocation7], 1 }

</bundles_post_ra>
